<compile_context>
chip_gen: v5e
topology: v5e:2x2
jax: 0.10.0
libtpu: 0.0.40
codegen_flags: <defaults>
</compile_context>

<pallas_src>
import jax
import jax.numpy as jnp
from jax.experimental import pallas as pl
from jax.experimental.pallas import tpu as pltpu  # noqa: F401

# ---------------- model dims (small, consistent with the module) -------------
VOCAB = 50
VOCAB_PAD = 64      # one-hot width padded to a nicer lane multiple
EMB = 32            # embedding_dim
HID = 32            # hidden_size
OUT = 4             # output_size (AG_NEWS has 4 classes)
OUT_PAD = 128       # lane-dense padded output width (sliced back to OUT in glue)
LAYERS = 2
BATCH = 2
SEQ = 8
PAD_IDX = 0         # stands in for vocab['0'] padding_idx


# ----------------------------- Pallas kernel --------------------------------
def _lstm_kernel(idx_ref, h_in_ref, c_in_ref,
                 tproj_ref, b0_ref, w_h0f_ref, whh1_ref, b1_ref,
                 wfc_ref, bfc_ref,
                 y_ref, hout_ref, cout_ref):
    """Whole-sequence embedding + 2-layer LSTM + fused output projection.

    Single invocation (no grid); time is a fully unrolled static loop with all
    carries resident in vregs.  Gate columns are pre-permuted to [i, f, o, g]
    and the i/f/o pre-activations are pre-scaled by 0.5 so one tanh per cell
    yields both sigmoid (0.5*t+0.5) and tanh activations.
    """
    SB = idx_ref.shape[0]            # S*B (rows are t-major: row = t*B + b)
    _, B, H = h_in_ref.shape
    S = SB // B
    H3, H4, H8 = 3 * H, 4 * H, 8 * H
    VP = tproj_ref.shape[0]

    # (1) Embedding lookup fused with the layer-0 input projection:
    #     one_hot(idx) @ (embedding @ W_ih_l0) for every (t, b) row, one MXU call.
    idx = idx_ref[...]                                              # (S*B, 1) int32
    vocab_iota = jax.lax.broadcasted_iota(jnp.int32, (SB, VP), 1)
    one_hot = (vocab_iota == idx).astype(jnp.float32)               # (S*B, VP)
    g0_all = (jnp.dot(one_hot, tproj_ref[...],
                      preferred_element_type=jnp.float32)
              + b0_ref[...])                                        # (S*B, 4H)

    w_h0f = w_h0f_ref[...]     # (H, 8H) = [W_ih_l1 | W_hh_l0], permuted+scaled
    whh1 = whh1_ref[...]       # (H, 4H)
    b1 = b1_ref[...]           # (1, 4H)

    h0 = h_in_ref[0]
    c0 = c_in_ref[0]
    h1 = h_in_ref[1]
    c1 = c_in_ref[1]

    # constant lane mask: first 3H gate columns (i, f, o) use the sigmoid recovery
    io_mask = jax.lax.broadcasted_iota(jnp.int32, (B, H4), 1) < H3

    def gate_math(gates, c_prev):
        # single transcendental push over the full (B, 4H) gate vreg
        t = jnp.tanh(gates)
        act = jnp.where(io_mask, 0.5 * t + 0.5, t)   # sigmoid for i/f/o, tanh for g
        i = act[:, 0:H]
        f = act[:, H:2 * H]
        o = act[:, 2 * H:H3]
        g = act[:, H3:H4]
        c_new = f * c_prev + i * g
        h_new = o * jnp.tanh(c_new)
        return h_new, c_new

    # prologue: the W_hh_l0 half of m supplies g0's recurrent term for step 0
    m = jnp.dot(h0, w_h0f, preferred_element_type=jnp.float32)      # (B, 8H)

    h1_steps = []
    for t in range(S):
        # layer 0: precomputed input gates + W_hh_l0 half of the fused matmul
        g0 = g0_all[t * B:(t + 1) * B, :] + m[:, H4:H8]
        h0, c0 = gate_math(g0, c0)

        # layer 1: h1(t-1) @ W_hh_l1 depends only on h1(t-1) -> off the critical
        # h0 chain; the fused h0(t) @ [W_ih_l1 | W_hh_l0] matmul produces this
        # step's layer-1 input gates AND next step's layer-0 recurrent term.
        g1_hh = jnp.dot(h1, whh1, preferred_element_type=jnp.float32) + b1
        m = jnp.dot(h0, w_h0f, preferred_element_type=jnp.float32)
        g1 = m[:, 0:H4] + g1_hh
        # TODO(synk): inter-layer dropout (p=0.5, training mode) not implemented.
        h1, c1 = gate_math(g1, c1)
        h1_steps.append(h1)                                         # stays in vregs

    # (3) Fused fc_out over the whole sequence, lane-dense (padded) store.
    h1_all = jnp.concatenate(h1_steps, axis=0)                      # (S*B, H), t-major
    y = (jnp.dot(h1_all, wfc_ref[...], preferred_element_type=jnp.float32)
         + bfc_ref[...])
    y_ref[...] = y                                                  # (S*B, OUT_PAD)

    # (4) Final states written exactly once.
    hout_ref[0] = h0
    hout_ref[1] = h1
    cout_ref[0] = c0
    cout_ref[1] = c1


# ------------------- one-time parameter preprocessing ------------------------
def preprocess_params(params):
    """Hoisted out of the forward path: layout, permutation, scaling, fusion."""
    H = HID
    # permute gate columns from PyTorch order (i, f, g, o) to (i, f, o, g)
    perm = jnp.concatenate([jnp.arange(0, 2 * H),          # i, f
                            jnp.arange(3 * H, 4 * H),      # o
                            jnp.arange(2 * H, 3 * H)])     # g
    # pre-scale i/f/o columns by 0.5 for the single-tanh sigmoid recovery
    scale = jnp.concatenate([jnp.full((3 * H,), 0.5, jnp.float32),
                             jnp.ones((H,), jnp.float32)])

    def prep_w(w):                      # (4H, in) PyTorch layout -> (in, 4H)
        return w.T[:, perm] * scale[None, :]

    def prep_b(bih, bhh):
        return ((bih + bhh)[perm] * scale).reshape(1, 4 * H)

    wih0 = prep_w(params["w_ih_l0"])    # (E, 4H)
    whh0 = prep_w(params["w_hh_l0"])    # (H, 4H)
    wih1 = prep_w(params["w_ih_l1"])    # (H, 4H)
    whh1 = prep_w(params["w_hh_l1"])    # (H, 4H)
    b0 = prep_b(params["b_ih_l0"], params["b_hh_l0"])
    b1 = prep_b(params["b_ih_l1"], params["b_hh_l1"])

    # fuse embedding table with the layer-0 input projection: tproj[v] = emb[v] @ W_ih0
    tproj = jnp.zeros((VOCAB_PAD, 4 * H), jnp.float32).at[:VOCAB, :].set(
        params["embedding"] @ wih0)

    # fused per-step weight: h0 @ [W_ih_l1 | W_hh_l0]
    w_h0f = jnp.concatenate([wih1, whh0], axis=1)           # (H, 8H)

    # zero-pad fc_out to a lane-dense 128-wide output
    wfc = jnp.zeros((H, OUT_PAD), jnp.float32).at[:, :OUT].set(params["w_fc"].T)
    bfc = jnp.zeros((1, OUT_PAD), jnp.float32).at[:, :OUT].set(params["b_fc"])

    return {"tproj": tproj, "b0": b0, "w_h0f": w_h0f, "whh1": whh1,
            "b1": b1, "wfc": wfc, "bfc": bfc}


# ------------------------------ forward wrapper -------------------------------
_FLOPS = (2 * SEQ * BATCH * VOCAB_PAD * 4 * HID
          + SEQ * (2 * BATCH * HID * 8 * HID + 2 * BATCH * HID * 4 * HID)
          + 2 * SEQ * BATCH * HID * OUT_PAD)
_TRANS = SEQ * 2 * (BATCH * 4 * HID + BATCH * HID)
_BYTES = 4 * (SEQ * BATCH
              + VOCAB_PAD * 4 * HID + 4 * HID
              + HID * 8 * HID + HID * 4 * HID + 4 * HID
              + HID * OUT_PAD + OUT_PAD
              + SEQ * BATCH * OUT_PAD
              + 4 * LAYERS * BATCH * HID)


def _lstm_forward(input_seq, hidden_in, mem_in, prep):
    B, S = input_seq.shape
    # t-major flat indices: row = t*B + b  -> per-step contiguous sublane slices
    idx = input_seq.T.reshape(S * B, 1).astype(jnp.int32)

    y_flat, hidden_out, mem_out = pl.pallas_call(
        _lstm_kernel,
        out_shape=(
            jax.ShapeDtypeStruct((S * B, OUT_PAD), jnp.float32),
            jax.ShapeDtypeStruct((LAYERS, B, HID), jnp.float32),
            jax.ShapeDtypeStruct((LAYERS, B, HID), jnp.float32),
        ),
        cost_estimate=pl.CostEstimate(flops=_FLOPS, transcendentals=_TRANS,
                                      bytes_accessed=_BYTES),
    )(idx, hidden_in, mem_in,
      prep["tproj"], prep["b0"], prep["w_h0f"], prep["whh1"], prep["b1"],
      prep["wfc"], prep["bfc"])

    # wrapper-side layout fixup: (S*B, 128) -> (B, S, OUT)
    logits = y_flat.reshape(S, B, OUT_PAD)[:, :, :OUT].transpose(1, 0, 2)
    return logits, hidden_out, mem_out


lstm_pallas = jax.jit(_lstm_forward)


# -------------------------- pure-JAX reference -------------------------------
def lstm_reference(input_seq, hidden_in, mem_in, params):
    emb = params["embedding"][input_seq]                       # (B, S, E)

    def cell(x, h, c, wih, whh, bih, bhh):
        gates = x @ wih.T + bih + h @ whh.T + bhh
        i, f, g, o = jnp.split(gates, 4, axis=-1)
        i, f, g, o = jax.nn.sigmoid(i), jax.nn.sigmoid(f), jnp.tanh(g), jax.nn.sigmoid(o)
        c = f * c + i * g
        h = o * jnp.tanh(c)
        return h, c

    h0, c0 = hidden_in[0], mem_in[0]
    h1, c1 = hidden_in[1], mem_in[1]
    outs = []
    for t in range(input_seq.shape[1]):
        x_t = emb[:, t, :]
        h0, c0 = cell(x_t, h0, c0, params["w_ih_l0"], params["w_hh_l0"],
                      params["b_ih_l0"], params["b_hh_l0"])
        h1, c1 = cell(h0, h1, c1, params["w_ih_l1"], params["w_hh_l1"],
                      params["b_ih_l1"], params["b_hh_l1"])
        outs.append(h1)
    out = jnp.stack(outs, axis=1)                              # (B, S, H)
    logits = out @ params["w_fc"].T + params["b_fc"]
    hidden_out = jnp.stack([h0, h1], axis=0)
    mem_out = jnp.stack([c0, c1], axis=0)
    return logits, hidden_out, mem_out


# -------------------------------- params -------------------------------------
def init_params(key):
    k = 1.0 / jnp.sqrt(jnp.float32(HID))
    names_shapes = [
        ("embedding", (VOCAB, EMB)),
        ("w_ih_l0", (4 * HID, EMB)), ("w_hh_l0", (4 * HID, HID)),
        ("b_ih_l0", (4 * HID,)), ("b_hh_l0", (4 * HID,)),
        ("w_ih_l1", (4 * HID, HID)), ("w_hh_l1", (4 * HID, HID)),
        ("b_ih_l1", (4 * HID,)), ("b_hh_l1", (4 * HID,)),
        ("w_fc", (OUT, HID)), ("b_fc", (OUT,)),
    ]
    keys = jax.random.split(key, len(names_shapes))
    params = {}
    for (name, shape), kk in zip(names_shapes, keys):
        if name == "embedding":
            w = jax.random.normal(kk, shape, dtype=jnp.float32)
            w = w.at[PAD_IDX].set(0.0)                         # padding_idx row = 0
        else:
            w = jax.random.uniform(kk, shape, dtype=jnp.float32, minval=-k, maxval=k)
        params[name] = w
    return params


# --------------------------------- main ---------------------------------------
if __name__ == "__main__":
    root = jax.random.PRNGKey(0)
    kp, ki, kh, kc = jax.random.split(root, 4)

    params = init_params(kp)
    input_seq = jax.random.randint(ki, (BATCH, SEQ), 0, VOCAB, dtype=jnp.int32)
    hidden_in = jax.random.normal(kh, (LAYERS, BATCH, HID), dtype=jnp.float32)
    mem_in = jax.random.normal(kc, (LAYERS, BATCH, HID), dtype=jnp.float32)

    prep = preprocess_params(params)            # one-time, outside the hot path

    logits, h_out, c_out = lstm_pallas(input_seq, hidden_in, mem_in, prep)
    jax.block_until_ready((logits, h_out, c_out))

    ref_logits, ref_h, ref_c = lstm_reference(input_seq, hidden_in, mem_in, params)

    assert logits.shape == (BATCH, SEQ, OUT)
    assert h_out.shape == (LAYERS, BATCH, HID)
    assert c_out.shape == (LAYERS, BATCH, HID)
    assert jnp.allclose(logits, ref_logits, atol=5e-5, rtol=5e-5)
    assert jnp.allclose(h_out, ref_h, atol=5e-5, rtol=5e-5)
    assert jnp.allclose(c_out, ref_c, atol=5e-5, rtol=5e-5)

    print("KERNEL_OK")
</pallas_src>

<mosaic_0001>
module attributes {stable_mosaic.version = 11 : i64} {
  func.func @_lstm_kernel(%arg0: memref<16x1xi32, #tpu.memory_space<vmem>>, %arg1: memref<2x2x32xf32, #tpu.memory_space<vmem>>, %arg2: memref<2x2x32xf32, #tpu.memory_space<vmem>>, %arg3: memref<64x128xf32, #tpu.memory_space<vmem>>, %arg4: memref<1x128xf32, #tpu.memory_space<vmem>>, %arg5: memref<32x256xf32, #tpu.memory_space<vmem>>, %arg6: memref<32x128xf32, #tpu.memory_space<vmem>>, %arg7: memref<1x128xf32, #tpu.memory_space<vmem>>, %arg8: memref<32x128xf32, #tpu.memory_space<vmem>>, %arg9: memref<1x128xf32, #tpu.memory_space<vmem>>, %arg10: memref<16x128xf32, #tpu.memory_space<vmem>>, %arg11: memref<2x2x32xf32, #tpu.memory_space<vmem>>, %arg12: memref<2x2x32xf32, #tpu.memory_space<vmem>>) attributes {dimension_semantics = [], scalar_prefetch = 0 : i64, scratch_operands = 0 : i64, tpu.core_type = #tpu.core_type<tc>} {
    %c0 = arith.constant 0 : index
    %c0_0 = arith.constant 0 : index
    %0 = vector.load %arg0[%c0, %c0_0] : memref<16x1xi32, #tpu.memory_space<vmem>>, vector<16x1xi32>
    %1 = tpu.iota {dimensions = array<i32: 1>} : vector<16x64xi32>
    %2 = vector.broadcast %0 : vector<16x1xi32> to vector<16x64xi32>
    %3 = arith.cmpi eq, %1, %2 : vector<16x64xi32>
    %4 = arith.extui %3 : vector<16x64xi1> to vector<16x64xi32>
    %5 = arith.sitofp %4 : vector<16x64xi32> to vector<16x64xf32>
    %c0_1 = arith.constant 0 : index
    %c0_2 = arith.constant 0 : index
    %6 = vector.load %arg3[%c0_1, %c0_2] : memref<64x128xf32, #tpu.memory_space<vmem>>, vector<64x128xf32>
    %cst = arith.constant dense<0.000000e+00> : vector<16x128xf32>
    %7 = tpu.matmul %5, %6, %cst {dimension_numbers = #tpu.dot_dimension_numbers<[1], [0], [0], [1], [0, 0, 1, 1], [], []>} : vector<16x64xf32>, vector<64x128xf32>, vector<16x128xf32> -> vector<16x128xf32>
    %c0_3 = arith.constant 0 : index
    %c0_4 = arith.constant 0 : index
    %8 = vector.load %arg4[%c0_3, %c0_4] : memref<1x128xf32, #tpu.memory_space<vmem>>, vector<1x128xf32>
    %9 = vector.broadcast %8 : vector<1x128xf32> to vector<16x128xf32>
    %10 = arith.addf %7, %9 : vector<16x128xf32>
    %c0_5 = arith.constant 0 : index
    %c0_6 = arith.constant 0 : index
    %11 = vector.load %arg5[%c0_5, %c0_6] : memref<32x256xf32, #tpu.memory_space<vmem>>, vector<32x256xf32>
    %c0_7 = arith.constant 0 : index
    %c0_8 = arith.constant 0 : index
    %12 = vector.load %arg6[%c0_7, %c0_8] : memref<32x128xf32, #tpu.memory_space<vmem>>, vector<32x128xf32>
    %c0_9 = arith.constant 0 : index
    %c0_10 = arith.constant 0 : index
    %13 = vector.load %arg7[%c0_9, %c0_10] : memref<1x128xf32, #tpu.memory_space<vmem>>, vector<1x128xf32>
    %c0_11 = arith.constant 0 : index
    %c0_12 = arith.constant 0 : index
    %c0_13 = arith.constant 0 : index
    %14 = vector.load %arg1[%c0_11, %c0_12, %c0_13] : memref<2x2x32xf32, #tpu.memory_space<vmem>>, vector<1x2x32xf32>
    %15 = vector.shape_cast %14 : vector<1x2x32xf32> to vector<2x32xf32>
    %c0_14 = arith.constant 0 : index
    %c0_15 = arith.constant 0 : index
    %c0_16 = arith.constant 0 : index
    %16 = vector.load %arg2[%c0_14, %c0_15, %c0_16] : memref<2x2x32xf32, #tpu.memory_space<vmem>>, vector<1x2x32xf32>
    %17 = vector.shape_cast %16 : vector<1x2x32xf32> to vector<2x32xf32>
    %c1 = arith.constant 1 : index
    %c0_17 = arith.constant 0 : index
    %c0_18 = arith.constant 0 : index
    %18 = vector.load %arg1[%c1, %c0_17, %c0_18] : memref<2x2x32xf32, #tpu.memory_space<vmem>>, vector<1x2x32xf32>
    %19 = vector.shape_cast %18 : vector<1x2x32xf32> to vector<2x32xf32>
    %c1_19 = arith.constant 1 : index
    %c0_20 = arith.constant 0 : index
    %c0_21 = arith.constant 0 : index
    %20 = vector.load %arg2[%c1_19, %c0_20, %c0_21] : memref<2x2x32xf32, #tpu.memory_space<vmem>>, vector<1x2x32xf32>
    %21 = vector.shape_cast %20 : vector<1x2x32xf32> to vector<2x32xf32>
    %22 = tpu.iota {dimensions = array<i32: 1>} : vector<2x128xi32>
    %c96_i32 = arith.constant 96 : i32
    %23 = vector.broadcast %c96_i32 : i32 to vector<2x128xi32>
    %24 = arith.cmpi slt, %22, %23 : vector<2x128xi32>
    %cst_22 = arith.constant dense<0.000000e+00> : vector<2x256xf32>
    %25 = tpu.matmul %15, %11, %cst_22 {dimension_numbers = #tpu.dot_dimension_numbers<[1], [0], [0], [1], [0, 0, 1, 1], [], []>} : vector<2x32xf32>, vector<32x256xf32>, vector<2x256xf32> -> vector<2x256xf32>
    %26 = vector.extract_strided_slice %10 {offsets = [0, 0], sizes = [2, 128], strides = [1, 1]} : vector<16x128xf32> to vector<2x128xf32>
    %27 = vector.extract_strided_slice %25 {offsets = [0, 128], sizes = [2, 128], strides = [1, 1]} : vector<2x256xf32> to vector<2x128xf32>
    %28 = arith.addf %26, %27 : vector<2x128xf32>
    %29 = math.tanh %28 : vector<2x128xf32>
    %cst_23 = arith.constant 5.000000e-01 : f32
    %30 = vector.broadcast %cst_23 : f32 to vector<2x128xf32>
    %31 = arith.mulf %30, %29 : vector<2x128xf32>
    %cst_24 = arith.constant 5.000000e-01 : f32
    %32 = vector.broadcast %cst_24 : f32 to vector<2x128xf32>
    %33 = arith.addf %31, %32 : vector<2x128xf32>
    %34 = arith.select %24, %33, %29 : vector<2x128xi1>, vector<2x128xf32>
    %35 = vector.extract_strided_slice %34 {offsets = [0, 0], sizes = [2, 32], strides = [1, 1]} : vector<2x128xf32> to vector<2x32xf32>
    %36 = vector.extract_strided_slice %34 {offsets = [0, 32], sizes = [2, 32], strides = [1, 1]} : vector<2x128xf32> to vector<2x32xf32>
    %37 = vector.extract_strided_slice %34 {offsets = [0, 64], sizes = [2, 32], strides = [1, 1]} : vector<2x128xf32> to vector<2x32xf32>
    %38 = vector.extract_strided_slice %34 {offsets = [0, 96], sizes = [2, 32], strides = [1, 1]} : vector<2x128xf32> to vector<2x32xf32>
    %39 = arith.mulf %36, %17 : vector<2x32xf32>
    %40 = arith.mulf %35, %38 : vector<2x32xf32>
    %41 = arith.addf %39, %40 : vector<2x32xf32>
    %42 = math.tanh %41 : vector<2x32xf32>
    %43 = arith.mulf %37, %42 : vector<2x32xf32>
    %cst_25 = arith.constant dense<0.000000e+00> : vector<2x128xf32>
    %44 = tpu.matmul %19, %12, %cst_25 {dimension_numbers = #tpu.dot_dimension_numbers<[1], [0], [0], [1], [0, 0, 1, 1], [], []>} : vector<2x32xf32>, vector<32x128xf32>, vector<2x128xf32> -> vector<2x128xf32>
    %45 = vector.broadcast %13 : vector<1x128xf32> to vector<2x128xf32>
    %46 = arith.addf %44, %45 : vector<2x128xf32>
    %cst_26 = arith.constant dense<0.000000e+00> : vector<2x256xf32>
    %47 = tpu.matmul %43, %11, %cst_26 {dimension_numbers = #tpu.dot_dimension_numbers<[1], [0], [0], [1], [0, 0, 1, 1], [], []>} : vector<2x32xf32>, vector<32x256xf32>, vector<2x256xf32> -> vector<2x256xf32>
    %48 = vector.extract_strided_slice %47 {offsets = [0, 0], sizes = [2, 128], strides = [1, 1]} : vector<2x256xf32> to vector<2x128xf32>
    %49 = arith.addf %48, %46 : vector<2x128xf32>
    %50 = math.tanh %49 : vector<2x128xf32>
    %cst_27 = arith.constant 5.000000e-01 : f32
    %51 = vector.broadcast %cst_27 : f32 to vector<2x128xf32>
    %52 = arith.mulf %51, %50 : vector<2x128xf32>
    %cst_28 = arith.constant 5.000000e-01 : f32
    %53 = vector.broadcast %cst_28 : f32 to vector<2x128xf32>
    %54 = arith.addf %52, %53 : vector<2x128xf32>
    %55 = arith.select %24, %54, %50 : vector<2x128xi1>, vector<2x128xf32>
    %56 = vector.extract_strided_slice %55 {offsets = [0, 0], sizes = [2, 32], strides = [1, 1]} : vector<2x128xf32> to vector<2x32xf32>
    %57 = vector.extract_strided_slice %55 {offsets = [0, 32], sizes = [2, 32], strides = [1, 1]} : vector<2x128xf32> to vector<2x32xf32>
    %58 = vector.extract_strided_slice %55 {offsets = [0, 64], sizes = [2, 32], strides = [1, 1]} : vector<2x128xf32> to vector<2x32xf32>
    %59 = vector.extract_strided_slice %55 {offsets = [0, 96], sizes = [2, 32], strides = [1, 1]} : vector<2x128xf32> to vector<2x32xf32>
    %60 = arith.mulf %57, %21 : vector<2x32xf32>
    %61 = arith.mulf %56, %59 : vector<2x32xf32>
    %62 = arith.addf %60, %61 : vector<2x32xf32>
    %63 = math.tanh %62 : vector<2x32xf32>
    %64 = arith.mulf %58, %63 : vector<2x32xf32>
    %65 = vector.extract_strided_slice %10 {offsets = [2, 0], sizes = [2, 128], strides = [1, 1]} : vector<16x128xf32> to vector<2x128xf32>
    %66 = vector.extract_strided_slice %47 {offsets = [0, 128], sizes = [2, 128], strides = [1, 1]} : vector<2x256xf32> to vector<2x128xf32>
    %67 = arith.addf %65, %66 : vector<2x128xf32>
    %68 = math.tanh %67 : vector<2x128xf32>
    %cst_29 = arith.constant 5.000000e-01 : f32
    %69 = vector.broadcast %cst_29 : f32 to vector<2x128xf32>
    %70 = arith.mulf %69, %68 : vector<2x128xf32>
    %cst_30 = arith.constant 5.000000e-01 : f32
    %71 = vector.broadcast %cst_30 : f32 to vector<2x128xf32>
    %72 = arith.addf %70, %71 : vector<2x128xf32>
    %73 = arith.select %24, %72, %68 : vector<2x128xi1>, vector<2x128xf32>
    %74 = vector.extract_strided_slice %73 {offsets = [0, 0], sizes = [2, 32], strides = [1, 1]} : vector<2x128xf32> to vector<2x32xf32>
    %75 = vector.extract_strided_slice %73 {offsets = [0, 32], sizes = [2, 32], strides = [1, 1]} : vector<2x128xf32> to vector<2x32xf32>
    %76 = vector.extract_strided_slice %73 {offsets = [0, 64], sizes = [2, 32], strides = [1, 1]} : vector<2x128xf32> to vector<2x32xf32>
    %77 = vector.extract_strided_slice %73 {offsets = [0, 96], sizes = [2, 32], strides = [1, 1]} : vector<2x128xf32> to vector<2x32xf32>
    %78 = arith.mulf %75, %41 : vector<2x32xf32>
    %79 = arith.mulf %74, %77 : vector<2x32xf32>
    %80 = arith.addf %78, %79 : vector<2x32xf32>
    %81 = math.tanh %80 : vector<2x32xf32>
    %82 = arith.mulf %76, %81 : vector<2x32xf32>
    %cst_31 = arith.constant dense<0.000000e+00> : vector<2x128xf32>
    %83 = tpu.matmul %64, %12, %cst_31 {dimension_numbers = #tpu.dot_dimension_numbers<[1], [0], [0], [1], [0, 0, 1, 1], [], []>} : vector<2x32xf32>, vector<32x128xf32>, vector<2x128xf32> -> vector<2x128xf32>
    %84 = vector.broadcast %13 : vector<1x128xf32> to vector<2x128xf32>
    %85 = arith.addf %83, %84 : vector<2x128xf32>
    %cst_32 = arith.constant dense<0.000000e+00> : vector<2x256xf32>
    %86 = tpu.matmul %82, %11, %cst_32 {dimension_numbers = #tpu.dot_dimension_numbers<[1], [0], [0], [1], [0, 0, 1, 1], [], []>} : vector<2x32xf32>, vector<32x256xf32>, vector<2x256xf32> -> vector<2x256xf32>
    %87 = vector.extract_strided_slice %86 {offsets = [0, 0], sizes = [2, 128], strides = [1, 1]} : vector<2x256xf32> to vector<2x128xf32>
    %88 = arith.addf %87, %85 : vector<2x128xf32>
    %89 = math.tanh %88 : vector<2x128xf32>
    %cst_33 = arith.constant 5.000000e-01 : f32
    %90 = vector.broadcast %cst_33 : f32 to vector<2x128xf32>
    %91 = arith.mulf %90, %89 : vector<2x128xf32>
    %cst_34 = arith.constant 5.000000e-01 : f32
    %92 = vector.broadcast %cst_34 : f32 to vector<2x128xf32>
    %93 = arith.addf %91, %92 : vector<2x128xf32>
    %94 = arith.select %24, %93, %89 : vector<2x128xi1>, vector<2x128xf32>
    %95 = vector.extract_strided_slice %94 {offsets = [0, 0], sizes = [2, 32], strides = [1, 1]} : vector<2x128xf32> to vector<2x32xf32>
    %96 = vector.extract_strided_slice %94 {offsets = [0, 32], sizes = [2, 32], strides = [1, 1]} : vector<2x128xf32> to vector<2x32xf32>
    %97 = vector.extract_strided_slice %94 {offsets = [0, 64], sizes = [2, 32], strides = [1, 1]} : vector<2x128xf32> to vector<2x32xf32>
    %98 = vector.extract_strided_slice %94 {offsets = [0, 96], sizes = [2, 32], strides = [1, 1]} : vector<2x128xf32> to vector<2x32xf32>
    %99 = arith.mulf %96, %62 : vector<2x32xf32>
    %100 = arith.mulf %95, %98 : vector<2x32xf32>
    %101 = arith.addf %99, %100 : vector<2x32xf32>
    %102 = math.tanh %101 : vector<2x32xf32>
    %103 = arith.mulf %97, %102 : vector<2x32xf32>
    %104 = vector.extract_strided_slice %10 {offsets = [4, 0], sizes = [2, 128], strides = [1, 1]} : vector<16x128xf32> to vector<2x128xf32>
    %105 = vector.extract_strided_slice %86 {offsets = [0, 128], sizes = [2, 128], strides = [1, 1]} : vector<2x256xf32> to vector<2x128xf32>
    %106 = arith.addf %104, %105 : vector<2x128xf32>
    %107 = math.tanh %106 : vector<2x128xf32>
    %cst_35 = arith.constant 5.000000e-01 : f32
    %108 = vector.broadcast %cst_35 : f32 to vector<2x128xf32>
    %109 = arith.mulf %108, %107 : vector<2x128xf32>
    %cst_36 = arith.constant 5.000000e-01 : f32
    %110 = vector.broadcast %cst_36 : f32 to vector<2x128xf32>
    %111 = arith.addf %109, %110 : vector<2x128xf32>
    %112 = arith.select %24, %111, %107 : vector<2x128xi1>, vector<2x128xf32>
    %113 = vector.extract_strided_slice %112 {offsets = [0, 0], sizes = [2, 32], strides = [1, 1]} : vector<2x128xf32> to vector<2x32xf32>
    %114 = vector.extract_strided_slice %112 {offsets = [0, 32], sizes = [2, 32], strides = [1, 1]} : vector<2x128xf32> to vector<2x32xf32>
    %115 = vector.extract_strided_slice %112 {offsets = [0, 64], sizes = [2, 32], strides = [1, 1]} : vector<2x128xf32> to vector<2x32xf32>
    %116 = vector.extract_strided_slice %112 {offsets = [0, 96], sizes = [2, 32], strides = [1, 1]} : vector<2x128xf32> to vector<2x32xf32>
    %117 = arith.mulf %114, %80 : vector<2x32xf32>
    %118 = arith.mulf %113, %116 : vector<2x32xf32>
    %119 = arith.addf %117, %118 : vector<2x32xf32>
    %120 = math.tanh %119 : vector<2x32xf32>
    %121 = arith.mulf %115, %120 : vector<2x32xf32>
    %cst_37 = arith.constant dense<0.000000e+00> : vector<2x128xf32>
    %122 = tpu.matmul %103, %12, %cst_37 {dimension_numbers = #tpu.dot_dimension_numbers<[1], [0], [0], [1], [0, 0, 1, 1], [], []>} : vector<2x32xf32>, vector<32x128xf32>, vector<2x128xf32> -> vector<2x128xf32>
    %123 = vector.broadcast %13 : vector<1x128xf32> to vector<2x128xf32>
    %124 = arith.addf %122, %123 : vector<2x128xf32>
    %cst_38 = arith.constant dense<0.000000e+00> : vector<2x256xf32>
    %125 = tpu.matmul %121, %11, %cst_38 {dimension_numbers = #tpu.dot_dimension_numbers<[1], [0], [0], [1], [0, 0, 1, 1], [], []>} : vector<2x32xf32>, vector<32x256xf32>, vector<2x256xf32> -> vector<2x256xf32>
    %126 = vector.extract_strided_slice %125 {offsets = [0, 0], sizes = [2, 128], strides = [1, 1]} : vector<2x256xf32> to vector<2x128xf32>
    %127 = arith.addf %126, %124 : vector<2x128xf32>
    %128 = math.tanh %127 : vector<2x128xf32>
    %cst_39 = arith.constant 5.000000e-01 : f32
    %129 = vector.broadcast %cst_39 : f32 to vector<2x128xf32>
    %130 = arith.mulf %129, %128 : vector<2x128xf32>
    %cst_40 = arith.constant 5.000000e-01 : f32
    %131 = vector.broadcast %cst_40 : f32 to vector<2x128xf32>
    %132 = arith.addf %130, %131 : vector<2x128xf32>
    %133 = arith.select %24, %132, %128 : vector<2x128xi1>, vector<2x128xf32>
    %134 = vector.extract_strided_slice %133 {offsets = [0, 0], sizes = [2, 32], strides = [1, 1]} : vector<2x128xf32> to vector<2x32xf32>
    %135 = vector.extract_strided_slice %133 {offsets = [0, 32], sizes = [2, 32], strides = [1, 1]} : vector<2x128xf32> to vector<2x32xf32>
    %136 = vector.extract_strided_slice %133 {offsets = [0, 64], sizes = [2, 32], strides = [1, 1]} : vector<2x128xf32> to vector<2x32xf32>
    %137 = vector.extract_strided_slice %133 {offsets = [0, 96], sizes = [2, 32], strides = [1, 1]} : vector<2x128xf32> to vector<2x32xf32>
    %138 = arith.mulf %135, %101 : vector<2x32xf32>
    %139 = arith.mulf %134, %137 : vector<2x32xf32>
    %140 = arith.addf %138, %139 : vector<2x32xf32>
    %141 = math.tanh %140 : vector<2x32xf32>
    %142 = arith.mulf %136, %141 : vector<2x32xf32>
    %143 = vector.extract_strided_slice %10 {offsets = [6, 0], sizes = [2, 128], strides = [1, 1]} : vector<16x128xf32> to vector<2x128xf32>
    %144 = vector.extract_strided_slice %125 {offsets = [0, 128], sizes = [2, 128], strides = [1, 1]} : vector<2x256xf32> to vector<2x128xf32>
    %145 = arith.addf %143, %144 : vector<2x128xf32>
    %146 = math.tanh %145 : vector<2x128xf32>
    %cst_41 = arith.constant 5.000000e-01 : f32
    %147 = vector.broadcast %cst_41 : f32 to vector<2x128xf32>
    %148 = arith.mulf %147, %146 : vector<2x128xf32>
    %cst_42 = arith.constant 5.000000e-01 : f32
    %149 = vector.broadcast %cst_42 : f32 to vector<2x128xf32>
    %150 = arith.addf %148, %149 : vector<2x128xf32>
    %151 = arith.select %24, %150, %146 : vector<2x128xi1>, vector<2x128xf32>
    %152 = vector.extract_strided_slice %151 {offsets = [0, 0], sizes = [2, 32], strides = [1, 1]} : vector<2x128xf32> to vector<2x32xf32>
    %153 = vector.extract_strided_slice %151 {offsets = [0, 32], sizes = [2, 32], strides = [1, 1]} : vector<2x128xf32> to vector<2x32xf32>
    %154 = vector.extract_strided_slice %151 {offsets = [0, 64], sizes = [2, 32], strides = [1, 1]} : vector<2x128xf32> to vector<2x32xf32>
    %155 = vector.extract_strided_slice %151 {offsets = [0, 96], sizes = [2, 32], strides = [1, 1]} : vector<2x128xf32> to vector<2x32xf32>
    %156 = arith.mulf %153, %119 : vector<2x32xf32>
    %157 = arith.mulf %152, %155 : vector<2x32xf32>
    %158 = arith.addf %156, %157 : vector<2x32xf32>
    %159 = math.tanh %158 : vector<2x32xf32>
    %160 = arith.mulf %154, %159 : vector<2x32xf32>
    %cst_43 = arith.constant dense<0.000000e+00> : vector<2x128xf32>
    %161 = tpu.matmul %142, %12, %cst_43 {dimension_numbers = #tpu.dot_dimension_numbers<[1], [0], [0], [1], [0, 0, 1, 1], [], []>} : vector<2x32xf32>, vector<32x128xf32>, vector<2x128xf32> -> vector<2x128xf32>
    %162 = vector.broadcast %13 : vector<1x128xf32> to vector<2x128xf32>
    %163 = arith.addf %161, %162 : vector<2x128xf32>
    %cst_44 = arith.constant dense<0.000000e+00> : vector<2x256xf32>
    %164 = tpu.matmul %160, %11, %cst_44 {dimension_numbers = #tpu.dot_dimension_numbers<[1], [0], [0], [1], [0, 0, 1, 1], [], []>} : vector<2x32xf32>, vector<32x256xf32>, vector<2x256xf32> -> vector<2x256xf32>
    %165 = vector.extract_strided_slice %164 {offsets = [0, 0], sizes = [2, 128], strides = [1, 1]} : vector<2x256xf32> to vector<2x128xf32>
    %166 = arith.addf %165, %163 : vector<2x128xf32>
    %167 = math.tanh %166 : vector<2x128xf32>
    %cst_45 = arith.constant 5.000000e-01 : f32
    %168 = vector.broadcast %cst_45 : f32 to vector<2x128xf32>
    %169 = arith.mulf %168, %167 : vector<2x128xf32>
    %cst_46 = arith.constant 5.000000e-01 : f32
    %170 = vector.broadcast %cst_46 : f32 to vector<2x128xf32>
    %171 = arith.addf %169, %170 : vector<2x128xf32>
    %172 = arith.select %24, %171, %167 : vector<2x128xi1>, vector<2x128xf32>
    %173 = vector.extract_strided_slice %172 {offsets = [0, 0], sizes = [2, 32], strides = [1, 1]} : vector<2x128xf32> to vector<2x32xf32>
    %174 = vector.extract_strided_slice %172 {offsets = [0, 32], sizes = [2, 32], strides = [1, 1]} : vector<2x128xf32> to vector<2x32xf32>
    %175 = vector.extract_strided_slice %172 {offsets = [0, 64], sizes = [2, 32], strides = [1, 1]} : vector<2x128xf32> to vector<2x32xf32>
    %176 = vector.extract_strided_slice %172 {offsets = [0, 96], sizes = [2, 32], strides = [1, 1]} : vector<2x128xf32> to vector<2x32xf32>
    %177 = arith.mulf %174, %140 : vector<2x32xf32>
    %178 = arith.mulf %173, %176 : vector<2x32xf32>
    %179 = arith.addf %177, %178 : vector<2x32xf32>
    %180 = math.tanh %179 : vector<2x32xf32>
    %181 = arith.mulf %175, %180 : vector<2x32xf32>
    %182 = vector.extract_strided_slice %10 {offsets = [8, 0], sizes = [2, 128], strides = [1, 1]} : vector<16x128xf32> to vector<2x128xf32>
    %183 = vector.extract_strided_slice %164 {offsets = [0, 128], sizes = [2, 128], strides = [1, 1]} : vector<2x256xf32> to vector<2x128xf32>
    %184 = arith.addf %182, %183 : vector<2x128xf32>
    %185 = math.tanh %184 : vector<2x128xf32>
    %cst_47 = arith.constant 5.000000e-01 : f32
    %186 = vector.broadcast %cst_47 : f32 to vector<2x128xf32>
    %187 = arith.mulf %186, %185 : vector<2x128xf32>
    %cst_48 = arith.constant 5.000000e-01 : f32
    %188 = vector.broadcast %cst_48 : f32 to vector<2x128xf32>
    %189 = arith.addf %187, %188 : vector<2x128xf32>
    %190 = arith.select %24, %189, %185 : vector<2x128xi1>, vector<2x128xf32>
    %191 = vector.extract_strided_slice %190 {offsets = [0, 0], sizes = [2, 32], strides = [1, 1]} : vector<2x128xf32> to vector<2x32xf32>
    %192 = vector.extract_strided_slice %190 {offsets = [0, 32], sizes = [2, 32], strides = [1, 1]} : vector<2x128xf32> to vector<2x32xf32>
    %193 = vector.extract_strided_slice %190 {offsets = [0, 64], sizes = [2, 32], strides = [1, 1]} : vector<2x128xf32> to vector<2x32xf32>
    %194 = vector.extract_strided_slice %190 {offsets = [0, 96], sizes = [2, 32], strides = [1, 1]} : vector<2x128xf32> to vector<2x32xf32>
    %195 = arith.mulf %192, %158 : vector<2x32xf32>
    %196 = arith.mulf %191, %194 : vector<2x32xf32>
    %197 = arith.addf %195, %196 : vector<2x32xf32>
    %198 = math.tanh %197 : vector<2x32xf32>
    %199 = arith.mulf %193, %198 : vector<2x32xf32>
    %cst_49 = arith.constant dense<0.000000e+00> : vector<2x128xf32>
    %200 = tpu.matmul %181, %12, %cst_49 {dimension_numbers = #tpu.dot_dimension_numbers<[1], [0], [0], [1], [0, 0, 1, 1], [], []>} : vector<2x32xf32>, vector<32x128xf32>, vector<2x128xf32> -> vector<2x128xf32>
    %201 = vector.broadcast %13 : vector<1x128xf32> to vector<2x128xf32>
    %202 = arith.addf %200, %201 : vector<2x128xf32>
    %cst_50 = arith.constant dense<0.000000e+00> : vector<2x256xf32>
    %203 = tpu.matmul %199, %11, %cst_50 {dimension_numbers = #tpu.dot_dimension_numbers<[1], [0], [0], [1], [0, 0, 1, 1], [], []>} : vector<2x32xf32>, vector<32x256xf32>, vector<2x256xf32> -> vector<2x256xf32>
    %204 = vector.extract_strided_slice %203 {offsets = [0, 0], sizes = [2, 128], strides = [1, 1]} : vector<2x256xf32> to vector<2x128xf32>
    %205 = arith.addf %204, %202 : vector<2x128xf32>
    %206 = math.tanh %205 : vector<2x128xf32>
    %cst_51 = arith.constant 5.000000e-01 : f32
    %207 = vector.broadcast %cst_51 : f32 to vector<2x128xf32>
    %208 = arith.mulf %207, %206 : vector<2x128xf32>
    %cst_52 = arith.constant 5.000000e-01 : f32
    %209 = vector.broadcast %cst_52 : f32 to vector<2x128xf32>
    %210 = arith.addf %208, %209 : vector<2x128xf32>
    %211 = arith.select %24, %210, %206 : vector<2x128xi1>, vector<2x128xf32>
    %212 = vector.extract_strided_slice %211 {offsets = [0, 0], sizes = [2, 32], strides = [1, 1]} : vector<2x128xf32> to vector<2x32xf32>
    %213 = vector.extract_strided_slice %211 {offsets = [0, 32], sizes = [2, 32], strides = [1, 1]} : vector<2x128xf32> to vector<2x32xf32>
    %214 = vector.extract_strided_slice %211 {offsets = [0, 64], sizes = [2, 32], strides = [1, 1]} : vector<2x128xf32> to vector<2x32xf32>
    %215 = vector.extract_strided_slice %211 {offsets = [0, 96], sizes = [2, 32], strides = [1, 1]} : vector<2x128xf32> to vector<2x32xf32>
    %216 = arith.mulf %213, %179 : vector<2x32xf32>
    %217 = arith.mulf %212, %215 : vector<2x32xf32>
    %218 = arith.addf %216, %217 : vector<2x32xf32>
    %219 = math.tanh %218 : vector<2x32xf32>
    %220 = arith.mulf %214, %219 : vector<2x32xf32>
    %221 = vector.extract_strided_slice %10 {offsets = [10, 0], sizes = [2, 128], strides = [1, 1]} : vector<16x128xf32> to vector<2x128xf32>
    %222 = vector.extract_strided_slice %203 {offsets = [0, 128], sizes = [2, 128], strides = [1, 1]} : vector<2x256xf32> to vector<2x128xf32>
    %223 = arith.addf %221, %222 : vector<2x128xf32>
    %224 = math.tanh %223 : vector<2x128xf32>
    %cst_53 = arith.constant 5.000000e-01 : f32
    %225 = vector.broadcast %cst_53 : f32 to vector<2x128xf32>
    %226 = arith.mulf %225, %224 : vector<2x128xf32>
    %cst_54 = arith.constant 5.000000e-01 : f32
    %227 = vector.broadcast %cst_54 : f32 to vector<2x128xf32>
    %228 = arith.addf %226, %227 : vector<2x128xf32>
    %229 = arith.select %24, %228, %224 : vector<2x128xi1>, vector<2x128xf32>
    %230 = vector.extract_strided_slice %229 {offsets = [0, 0], sizes = [2, 32], strides = [1, 1]} : vector<2x128xf32> to vector<2x32xf32>
    %231 = vector.extract_strided_slice %229 {offsets = [0, 32], sizes = [2, 32], strides = [1, 1]} : vector<2x128xf32> to vector<2x32xf32>
    %232 = vector.extract_strided_slice %229 {offsets = [0, 64], sizes = [2, 32], strides = [1, 1]} : vector<2x128xf32> to vector<2x32xf32>
    %233 = vector.extract_strided_slice %229 {offsets = [0, 96], sizes = [2, 32], strides = [1, 1]} : vector<2x128xf32> to vector<2x32xf32>
    %234 = arith.mulf %231, %197 : vector<2x32xf32>
    %235 = arith.mulf %230, %233 : vector<2x32xf32>
    %236 = arith.addf %234, %235 : vector<2x32xf32>
    %237 = math.tanh %236 : vector<2x32xf32>
    %238 = arith.mulf %232, %237 : vector<2x32xf32>
    %cst_55 = arith.constant dense<0.000000e+00> : vector<2x128xf32>
    %239 = tpu.matmul %220, %12, %cst_55 {dimension_numbers = #tpu.dot_dimension_numbers<[1], [0], [0], [1], [0, 0, 1, 1], [], []>} : vector<2x32xf32>, vector<32x128xf32>, vector<2x128xf32> -> vector<2x128xf32>
    %240 = vector.broadcast %13 : vector<1x128xf32> to vector<2x128xf32>
    %241 = arith.addf %239, %240 : vector<2x128xf32>
    %cst_56 = arith.constant dense<0.000000e+00> : vector<2x256xf32>
    %242 = tpu.matmul %238, %11, %cst_56 {dimension_numbers = #tpu.dot_dimension_numbers<[1], [0], [0], [1], [0, 0, 1, 1], [], []>} : vector<2x32xf32>, vector<32x256xf32>, vector<2x256xf32> -> vector<2x256xf32>
    %243 = vector.extract_strided_slice %242 {offsets = [0, 0], sizes = [2, 128], strides = [1, 1]} : vector<2x256xf32> to vector<2x128xf32>
    %244 = arith.addf %243, %241 : vector<2x128xf32>
    %245 = math.tanh %244 : vector<2x128xf32>
    %cst_57 = arith.constant 5.000000e-01 : f32
    %246 = vector.broadcast %cst_57 : f32 to vector<2x128xf32>
    %247 = arith.mulf %246, %245 : vector<2x128xf32>
    %cst_58 = arith.constant 5.000000e-01 : f32
    %248 = vector.broadcast %cst_58 : f32 to vector<2x128xf32>
    %249 = arith.addf %247, %248 : vector<2x128xf32>
    %250 = arith.select %24, %249, %245 : vector<2x128xi1>, vector<2x128xf32>
    %251 = vector.extract_strided_slice %250 {offsets = [0, 0], sizes = [2, 32], strides = [1, 1]} : vector<2x128xf32> to vector<2x32xf32>
    %252 = vector.extract_strided_slice %250 {offsets = [0, 32], sizes = [2, 32], strides = [1, 1]} : vector<2x128xf32> to vector<2x32xf32>
    %253 = vector.extract_strided_slice %250 {offsets = [0, 64], sizes = [2, 32], strides = [1, 1]} : vector<2x128xf32> to vector<2x32xf32>
    %254 = vector.extract_strided_slice %250 {offsets = [0, 96], sizes = [2, 32], strides = [1, 1]} : vector<2x128xf32> to vector<2x32xf32>
    %255 = arith.mulf %252, %218 : vector<2x32xf32>
    %256 = arith.mulf %251, %254 : vector<2x32xf32>
    %257 = arith.addf %255, %256 : vector<2x32xf32>
    %258 = math.tanh %257 : vector<2x32xf32>
    %259 = arith.mulf %253, %258 : vector<2x32xf32>
    %260 = vector.extract_strided_slice %10 {offsets = [12, 0], sizes = [2, 128], strides = [1, 1]} : vector<16x128xf32> to vector<2x128xf32>
    %261 = vector.extract_strided_slice %242 {offsets = [0, 128], sizes = [2, 128], strides = [1, 1]} : vector<2x256xf32> to vector<2x128xf32>
    %262 = arith.addf %260, %261 : vector<2x128xf32>
    %263 = math.tanh %262 : vector<2x128xf32>
    %cst_59 = arith.constant 5.000000e-01 : f32
    %264 = vector.broadcast %cst_59 : f32 to vector<2x128xf32>
    %265 = arith.mulf %264, %263 : vector<2x128xf32>
    %cst_60 = arith.constant 5.000000e-01 : f32
    %266 = vector.broadcast %cst_60 : f32 to vector<2x128xf32>
    %267 = arith.addf %265, %266 : vector<2x128xf32>
    %268 = arith.select %24, %267, %263 : vector<2x128xi1>, vector<2x128xf32>
    %269 = vector.extract_strided_slice %268 {offsets = [0, 0], sizes = [2, 32], strides = [1, 1]} : vector<2x128xf32> to vector<2x32xf32>
    %270 = vector.extract_strided_slice %268 {offsets = [0, 32], sizes = [2, 32], strides = [1, 1]} : vector<2x128xf32> to vector<2x32xf32>
    %271 = vector.extract_strided_slice %268 {offsets = [0, 64], sizes = [2, 32], strides = [1, 1]} : vector<2x128xf32> to vector<2x32xf32>
    %272 = vector.extract_strided_slice %268 {offsets = [0, 96], sizes = [2, 32], strides = [1, 1]} : vector<2x128xf32> to vector<2x32xf32>
    %273 = arith.mulf %270, %236 : vector<2x32xf32>
    %274 = arith.mulf %269, %272 : vector<2x32xf32>
    %275 = arith.addf %273, %274 : vector<2x32xf32>
    %276 = math.tanh %275 : vector<2x32xf32>
    %277 = arith.mulf %271, %276 : vector<2x32xf32>
    %cst_61 = arith.constant dense<0.000000e+00> : vector<2x128xf32>
    %278 = tpu.matmul %259, %12, %cst_61 {dimension_numbers = #tpu.dot_dimension_numbers<[1], [0], [0], [1], [0, 0, 1, 1], [], []>} : vector<2x32xf32>, vector<32x128xf32>, vector<2x128xf32> -> vector<2x128xf32>
    %279 = vector.broadcast %13 : vector<1x128xf32> to vector<2x128xf32>
    %280 = arith.addf %278, %279 : vector<2x128xf32>
    %cst_62 = arith.constant dense<0.000000e+00> : vector<2x256xf32>
    %281 = tpu.matmul %277, %11, %cst_62 {dimension_numbers = #tpu.dot_dimension_numbers<[1], [0], [0], [1], [0, 0, 1, 1], [], []>} : vector<2x32xf32>, vector<32x256xf32>, vector<2x256xf32> -> vector<2x256xf32>
    %282 = vector.extract_strided_slice %281 {offsets = [0, 0], sizes = [2, 128], strides = [1, 1]} : vector<2x256xf32> to vector<2x128xf32>
    %283 = arith.addf %282, %280 : vector<2x128xf32>
    %284 = math.tanh %283 : vector<2x128xf32>
    %cst_63 = arith.constant 5.000000e-01 : f32
    %285 = vector.broadcast %cst_63 : f32 to vector<2x128xf32>
    %286 = arith.mulf %285, %284 : vector<2x128xf32>
    %cst_64 = arith.constant 5.000000e-01 : f32
    %287 = vector.broadcast %cst_64 : f32 to vector<2x128xf32>
    %288 = arith.addf %286, %287 : vector<2x128xf32>
    %289 = arith.select %24, %288, %284 : vector<2x128xi1>, vector<2x128xf32>
    %290 = vector.extract_strided_slice %289 {offsets = [0, 0], sizes = [2, 32], strides = [1, 1]} : vector<2x128xf32> to vector<2x32xf32>
    %291 = vector.extract_strided_slice %289 {offsets = [0, 32], sizes = [2, 32], strides = [1, 1]} : vector<2x128xf32> to vector<2x32xf32>
    %292 = vector.extract_strided_slice %289 {offsets = [0, 64], sizes = [2, 32], strides = [1, 1]} : vector<2x128xf32> to vector<2x32xf32>
    %293 = vector.extract_strided_slice %289 {offsets = [0, 96], sizes = [2, 32], strides = [1, 1]} : vector<2x128xf32> to vector<2x32xf32>
    %294 = arith.mulf %291, %257 : vector<2x32xf32>
    %295 = arith.mulf %290, %293 : vector<2x32xf32>
    %296 = arith.addf %294, %295 : vector<2x32xf32>
    %297 = math.tanh %296 : vector<2x32xf32>
    %298 = arith.mulf %292, %297 : vector<2x32xf32>
    %299 = vector.extract_strided_slice %10 {offsets = [14, 0], sizes = [2, 128], strides = [1, 1]} : vector<16x128xf32> to vector<2x128xf32>
    %300 = vector.extract_strided_slice %281 {offsets = [0, 128], sizes = [2, 128], strides = [1, 1]} : vector<2x256xf32> to vector<2x128xf32>
    %301 = arith.addf %299, %300 : vector<2x128xf32>
    %302 = math.tanh %301 : vector<2x128xf32>
    %cst_65 = arith.constant 5.000000e-01 : f32
    %303 = vector.broadcast %cst_65 : f32 to vector<2x128xf32>
    %304 = arith.mulf %303, %302 : vector<2x128xf32>
    %cst_66 = arith.constant 5.000000e-01 : f32
    %305 = vector.broadcast %cst_66 : f32 to vector<2x128xf32>
    %306 = arith.addf %304, %305 : vector<2x128xf32>
    %307 = arith.select %24, %306, %302 : vector<2x128xi1>, vector<2x128xf32>
    %308 = vector.extract_strided_slice %307 {offsets = [0, 0], sizes = [2, 32], strides = [1, 1]} : vector<2x128xf32> to vector<2x32xf32>
    %309 = vector.extract_strided_slice %307 {offsets = [0, 32], sizes = [2, 32], strides = [1, 1]} : vector<2x128xf32> to vector<2x32xf32>
    %310 = vector.extract_strided_slice %307 {offsets = [0, 64], sizes = [2, 32], strides = [1, 1]} : vector<2x128xf32> to vector<2x32xf32>
    %311 = vector.extract_strided_slice %307 {offsets = [0, 96], sizes = [2, 32], strides = [1, 1]} : vector<2x128xf32> to vector<2x32xf32>
    %312 = arith.mulf %309, %275 : vector<2x32xf32>
    %313 = arith.mulf %308, %311 : vector<2x32xf32>
    %314 = arith.addf %312, %313 : vector<2x32xf32>
    %315 = math.tanh %314 : vector<2x32xf32>
    %316 = arith.mulf %310, %315 : vector<2x32xf32>
    %cst_67 = arith.constant dense<0.000000e+00> : vector<2x128xf32>
    %317 = tpu.matmul %298, %12, %cst_67 {dimension_numbers = #tpu.dot_dimension_numbers<[1], [0], [0], [1], [0, 0, 1, 1], [], []>} : vector<2x32xf32>, vector<32x128xf32>, vector<2x128xf32> -> vector<2x128xf32>
    %318 = vector.broadcast %13 : vector<1x128xf32> to vector<2x128xf32>
    %319 = arith.addf %317, %318 : vector<2x128xf32>
    %cst_68 = arith.constant dense<0.000000e+00> : vector<2x256xf32>
    %320 = tpu.matmul %316, %11, %cst_68 {dimension_numbers = #tpu.dot_dimension_numbers<[1], [0], [0], [1], [0, 0, 1, 1], [], []>} : vector<2x32xf32>, vector<32x256xf32>, vector<2x256xf32> -> vector<2x256xf32>
    %321 = vector.extract_strided_slice %320 {offsets = [0, 0], sizes = [2, 128], strides = [1, 1]} : vector<2x256xf32> to vector<2x128xf32>
    %322 = arith.addf %321, %319 : vector<2x128xf32>
    %323 = math.tanh %322 : vector<2x128xf32>
    %cst_69 = arith.constant 5.000000e-01 : f32
    %324 = vector.broadcast %cst_69 : f32 to vector<2x128xf32>
    %325 = arith.mulf %324, %323 : vector<2x128xf32>
    %cst_70 = arith.constant 5.000000e-01 : f32
    %326 = vector.broadcast %cst_70 : f32 to vector<2x128xf32>
    %327 = arith.addf %325, %326 : vector<2x128xf32>
    %328 = arith.select %24, %327, %323 : vector<2x128xi1>, vector<2x128xf32>
    %329 = vector.extract_strided_slice %328 {offsets = [0, 0], sizes = [2, 32], strides = [1, 1]} : vector<2x128xf32> to vector<2x32xf32>
    %330 = vector.extract_strided_slice %328 {offsets = [0, 32], sizes = [2, 32], strides = [1, 1]} : vector<2x128xf32> to vector<2x32xf32>
    %331 = vector.extract_strided_slice %328 {offsets = [0, 64], sizes = [2, 32], strides = [1, 1]} : vector<2x128xf32> to vector<2x32xf32>
    %332 = vector.extract_strided_slice %328 {offsets = [0, 96], sizes = [2, 32], strides = [1, 1]} : vector<2x128xf32> to vector<2x32xf32>
    %333 = arith.mulf %330, %296 : vector<2x32xf32>
    %334 = arith.mulf %329, %332 : vector<2x32xf32>
    %335 = arith.addf %333, %334 : vector<2x32xf32>
    %336 = math.tanh %335 : vector<2x32xf32>
    %337 = arith.mulf %331, %336 : vector<2x32xf32>
    %338 = tpu.concatenate %64, %103, %142, %181, %220, %259, %298, %337 in 0 : vector<2x32xf32>, vector<2x32xf32>, vector<2x32xf32>, vector<2x32xf32>, vector<2x32xf32>, vector<2x32xf32>, vector<2x32xf32>, vector<2x32xf32> -> vector<16x32xf32>
    %c0_71 = arith.constant 0 : index
    %c0_72 = arith.constant 0 : index
    %339 = vector.load %arg8[%c0_71, %c0_72] : memref<32x128xf32, #tpu.memory_space<vmem>>, vector<32x128xf32>
    %cst_73 = arith.constant dense<0.000000e+00> : vector<16x128xf32>
    %340 = tpu.matmul %338, %339, %cst_73 {dimension_numbers = #tpu.dot_dimension_numbers<[1], [0], [0], [1], [0, 0, 1, 1], [], []>} : vector<16x32xf32>, vector<32x128xf32>, vector<16x128xf32> -> vector<16x128xf32>
    %c0_74 = arith.constant 0 : index
    %c0_75 = arith.constant 0 : index
    %341 = vector.load %arg9[%c0_74, %c0_75] : memref<1x128xf32, #tpu.memory_space<vmem>>, vector<1x128xf32>
    %342 = vector.broadcast %341 : vector<1x128xf32> to vector<16x128xf32>
    %343 = arith.addf %340, %342 : vector<16x128xf32>
    %c0_76 = arith.constant 0 : index
    %c0_77 = arith.constant 0 : index
    %344 = vector.load %arg10[%c0_76, %c0_77] : memref<16x128xf32, #tpu.memory_space<vmem>>, vector<16x128xf32>
    tpu.vector_store %arg10[%c0_76, %c0_77], %343 {strides = array<i32>} : memref<16x128xf32, #tpu.memory_space<vmem>>, vector<16x128xf32>,
    %c0_78 = arith.constant 0 : index
    %c0_79 = arith.constant 0 : index
    %c0_80 = arith.constant 0 : index
    %345 = vector.load %arg11[%c0_78, %c0_79, %c0_80] : memref<2x2x32xf32, #tpu.memory_space<vmem>>, vector<1x2x32xf32>
    %346 = vector.shape_cast %345 : vector<1x2x32xf32> to vector<2x32xf32>
    %347 = vector.shape_cast %316 : vector<2x32xf32> to vector<1x2x32xf32>
    tpu.vector_store %arg11[%c0_78, %c0_79, %c0_80], %347 {strides = array<i32>} : memref<2x2x32xf32, #tpu.memory_space<vmem>>, vector<1x2x32xf32>,
    %c1_81 = arith.constant 1 : index
    %c0_82 = arith.constant 0 : index
    %c0_83 = arith.constant 0 : index
    %348 = vector.load %arg11[%c1_81, %c0_82, %c0_83] : memref<2x2x32xf32, #tpu.memory_space<vmem>>, vector<1x2x32xf32>
    %349 = vector.shape_cast %348 : vector<1x2x32xf32> to vector<2x32xf32>
    %350 = vector.shape_cast %337 : vector<2x32xf32> to vector<1x2x32xf32>
    tpu.vector_store %arg11[%c1_81, %c0_82, %c0_83], %350 {strides = array<i32>} : memref<2x2x32xf32, #tpu.memory_space<vmem>>, vector<1x2x32xf32>,
    %c0_84 = arith.constant 0 : index
    %c0_85 = arith.constant 0 : index
    %c0_86 = arith.constant 0 : index
    %351 = vector.load %arg12[%c0_84, %c0_85, %c0_86] : memref<2x2x32xf32, #tpu.memory_space<vmem>>, vector<1x2x32xf32>
    %352 = vector.shape_cast %351 : vector<1x2x32xf32> to vector<2x32xf32>
    %353 = vector.shape_cast %314 : vector<2x32xf32> to vector<1x2x32xf32>
    tpu.vector_store %arg12[%c0_84, %c0_85, %c0_86], %353 {strides = array<i32>} : memref<2x2x32xf32, #tpu.memory_space<vmem>>, vector<1x2x32xf32>,
    %c1_87 = arith.constant 1 : index
    %c0_88 = arith.constant 0 : index
    %c0_89 = arith.constant 0 : index
    %354 = vector.load %arg12[%c1_87, %c0_88, %c0_89] : memref<2x2x32xf32, #tpu.memory_space<vmem>>, vector<1x2x32xf32>
    %355 = vector.shape_cast %354 : vector<1x2x32xf32> to vector<2x32xf32>
    %356 = vector.shape_cast %335 : vector<2x32xf32> to vector<1x2x32xf32>
    tpu.vector_store %arg12[%c1_87, %c0_88, %c0_89], %356 {strides = array<i32>} : memref<2x2x32xf32, #tpu.memory_space<vmem>>, vector<1x2x32xf32>,
    return
  }
}

</mosaic_0001>

<bundles_post_ra>
// kernel: _lstm_forward.1
= control target key start
LH: loop header
LB: loop body
LE: loop exit
PB: predicated region body
PF: predicated region fallthrough
CT: control target
= control target key end

     0   :  { %18 = vsyncpa [#allocation3], 0  ;;  %s1998_s0 = inlined_call_operand.vmem [shape: s32[16,1], index: 0, kind: input, shape index: {}]   ;;  %s1999_s1 = inlined_call_operand.vmem [shape: f32[2,2,32], index: 1, kind: input, shape index: {}]   ;;  %s2000_s2 = inlined_call_operand.vmem [shape: f32[2,2,32], index: 2, kind: input, shape index: {}]   ;;  %s2001_s3 = inlined_call_operand.hbm [shape: f32[64,128], index: 3, kind: input, shape index: {}]   ;;  %s2002_s4 = inlined_call_operand.vmem [shape: f32[1,128], index: 4, kind: input, shape index: {}]   ;;  %s2003_s5 = inlined_call_operand.hbm [shape: f32[32,256], index: 5, kind: input, shape index: {}]   ;;  %s2004_s6 = inlined_call_operand.vmem [shape: f32[32,128], index: 6, kind: input, shape index: {}]   ;;  %s2005_s7 = inlined_call_operand.vmem [shape: f32[1,128], index: 7, kind: input, shape index: {}]   ;;  %s2006_s8 = inlined_call_operand.hbm [shape: f32[32,128], index: 8, kind: input, shape index: {}]   ;;  %s2007_s9 = inlined_call_operand.vmem [shape: f32[1,128], index: 9, kind: input, shape index: {}]   ;;  %s2008_s10 = inlined_call_operand.vmem [shape: f32[16,128], index: 10, kind: output, shape index: {0}]   ;;  %s2009_s11 = inlined_call_operand.hbm [shape: f32[2,2,32], index: 11, kind: output, shape index: {1}]   ;;  %s2010_s12 = inlined_call_operand.hbm [shape: f32[2,2,32], index: 12, kind: output, shape index: {2}]  }
   0x1   :  { %19 = vsyncpa [#allocation6], 0 }
   0x2   :  { %20 = vsyncpa [#allocation4], 0  ;;  %s47_s23 = sshll.u32 %s2003_s5, 4  ;;  %s48_s23 = int_to_ptr.hbm [resolvable:$true] %s47_s23 }
   0x3   :  { %21 = vsyncpa [#allocation10], 0  ;;  %s1507_s24 = smov [#allocation5]   ;;  %s32_s28 = sshll.u32 %s2001_s3, 4  ;;  %s33_s28 = int_to_ptr.hbm [resolvable:$true] %s32_s28 }
   0x4   :  { %s49_s25 = sshll.u32 %s1507_s24, 4  ;;  %s1508_s29 = smov 256   ;;  %s50_s25 = int_to_ptr.vmem [resolvable:$true] %s49_s25 }
   0x5   :  { %s1509_s30 = smov 16   ;;  %s1510_s13 = smov [#allocation2]  }
   0x6   :  { %55 = dma.hbm_to_vmem [thread:$0]  %s48_s23, 1024, %s50_s25, [#allocation6], %s1508_s29, %s1508_s29, %s1509_s30  }
   0x7   :  { %s34_s14 = sshll.u32 %s1510_s13, 4  ;;  %s1511_s15 = smov 128   ;;  %s35_s14 = int_to_ptr.vmem [resolvable:$true] %s34_s14 }
   0x8   :  { %s1512_s16 = smov 8   ;;  %s64_s18 = sshll.u32 %s2006_s8, 4  ;;  %s65_s18 = int_to_ptr.hbm [resolvable:$true] %s64_s18 }
   0x9   :  { %40 = dma.hbm_to_vmem [thread:$0]  %s33_s28, 1024, %s35_s14, [#allocation3], %s1511_s15, %s1511_s15, %s1512_s16  }
   0xa   :  { %s1513_s19 = smov [#allocation7]  }
   0xb   :  { %s66_s20 = sshll.u32 %s1513_s19, 4  ;;  %s67_s20 = int_to_ptr.vmem [resolvable:$true] %s66_s20 }
   0xc   :  { %72 = dma.hbm_to_vmem [thread:$0]  %s65_s18, 512, %s67_s20, [#allocation6], %s1511_s15, %s1511_s15, %s1512_s16  }
   0xd   :  { %1499 = dma.done.wait [#allocation3], 1024  }
   0xe   :  { %1500 = vsyncadd [#allocation3], 4294966272 }
   0xf   :  { %1501 = dma.done.wait [#allocation6], 1536  }
  0x10   :  { %1502 = vsyncadd [#allocation6], 4294965760  ;;  %v1514_v0 = vmov 0   ;;  %v87_v1 = vld [vmem:[%s1998_s0] sm:$0xff]  ;;  %v110_v2 = vld [vmem:[#allocation2 + $0x38] sm:$0xff]  ;;  %vm165_vm0 = vcmask 261120   ;;  %v89_v16 = vlaneseq }
  0x11   :  { %1311 = vset.pattern.permute.xlu0 %v1514_v0  ;;  %v109_v3 = vld [vmem:[#allocation2 + $0x30] sm:$0xff]  ;;  %130 = vmatpush.msra.mxu0 %v110_v2  ;;  %v108_v4 = vld [vmem:[#allocation2 + $0x28] sm:$0xff]  ;;  %v1599_v5 = vld [vmem:[#allocation5 + $0x38] sm:$0xff]  ;;  %s1515_s25 = smov 32   ;;  %vm115_vm1 = vcmask 523264   ;;  %v1516_v19 = vmov 0.0  }
  0x12   :  { %92 = vperm.xlu0 %1311, %v87_v1   ;;  %181 = vmatpush.msra.mxu1 %v1599_v5  ;;  %v1602_v6 = vld [vmem:[#allocation5 + $0x28] sm:$0xff]  ;;  %v107_v7 = vld [vmem:[#allocation2 + $0x20] sm:$0xff]  ;;  %v106_v8 = vld [vmem:[#allocation2 + $0x18] sm:$0xff]  ;;  %v1631_v17 = vand.u32 127, %v89_v16  ;;  %vm1148_vm5 = vcmask 1041408   ;;  %vm1150_vm6 = vcmask 1043456  }
  0x13   :  { %131 = vmatpush.msra.mxu0 %v109_v3  ;;  %v105_v9 = vld [vmem:[#allocation2 + $0x10] sm:$0xff]  ;;  %v104_v10 = vld [vmem:[#allocation2 + $0x8] sm:$0xff]  ;;  %v103_v11 = vld [vmem:[#allocation2] sm:$0xff]  ;;  %vm1152_vm7 = vcmask 1045504   ;;  %vm1203_vm8 = vcmask 261126   ;;  %vm1209_vm9 = vcmask 254976  }
  0x14   :  { %182 = vmatpush.msra.mxu1 %v1602_v6  ;;  %v1605_v12 = vld [vmem:[#allocation5 + $0x18] sm:$0xff]  ;;  %v1608_v13 = vld [vmem:[#allocation5 + $0x8] sm:$0xff]  ;;  %v158_v14 = vld [vmem:[%s1999_s1] sm:$0x3]  ;;  %vm164_vm3 = vcmp.lt.s32.totalorder %v1631_v17, 96  ;;  %s1243_s27 = sshll.u32 %s2010_s12, 4  ;;  %s1244_s27 = int_to_ptr.hbm [resolvable:$true] %s1243_s27 }
  0x15   :  { %132 = vmatpush.msra.mxu0 %v108_v4  ;;  %v159_v15 = vld [vmem:[%s2000_s2] sm:$0x3]  ;;  %v1657_v37 = vld [vmem:[%s2004_s6 + $0x18] sm:$0xff]  ;;  %v1662_v38 = vld [vmem:[%s2004_s6 + $0x10] sm:$0xff]  ;;  %s1521_s28 = smov [#allocation8]   ;;  %s1230_s14 = sshll.u32 %s2009_s11, 4  ;;  %s1231_s14 = int_to_ptr.hbm [resolvable:$true] %s1230_s14 }
  0x16   :  { %183 = vmatpush.msra.mxu1 %v1605_v12  ;;  %195 = vrot.lane.b32.xlu1 %v159_v15, %s1515_s25  ;;  %v1639_v21 = vld [vmem:[%s2002_s4] ss:$0 sm:$0xff]  ;;  %v1664_v39 = vld [vmem:[#allocation5 + $0x30] sm:$0xff]  ;;  %v1673_v41 = vld [vmem:[%s2004_s6 + $0x8] sm:$0xff]  ;;  %s1520_s4 = smov 2   ;;  %s1228_s29 = sshll.u32 %s1521_s28, 4  ;;  %s1229_s29 = int_to_ptr.vmem [resolvable:$true] %s1228_s29 }
  0x17   :  { %133 = vmatpush.msra.mxu0 %v107_v7  ;;  %233 = vmatpush.msra.mxu2 %v1657_v37  ;;  %v1668_v40 = vld [vmem:[#allocation5 + $0x20] sm:$0xff]  ;;  %v1675_v42 = vld [vmem:[#allocation5 + $0x10] sm:$0xff] }
  0x18   :  { %184 = vmatpush.msra.mxu1 %v1608_v13  ;;  %258 = vmatpush.msra.mxu3 %v1664_v39  ;;  %v1683_v43 = vld [vmem:[%s2004_s6] sm:$0xff] }
  0x19   :  { %134 = vmatpush.msra.mxu0 %v106_v8  ;;  %1270 = vmatmul.msk.f32.vlgmr.msra.gmra.mxu1 %vm165_vm0, %v158_v14  ;;  %v1685_v44 = vld [vmem:[#allocation5] sm:$0xff] }
  0x1a   :  { %278 = vmatpush.msrb.mxu1 %v1599_v5  ;;  %234 = vmatpush.msra.mxu2 %v1662_v38  ;;  %v1268_v45 = vld [vmem:[%s1999_s1 + $0x2] sm:$0x3]  ;;  %s1517_s1 = smov 64   ;;  %v1728_v50 = vld [vmem:[%s2005_s7] ss:$0 sm:$0xff] }
  0x1b   :  { %135 = vmatpush.msra.mxu0 %v105_v9  ;;  %259 = vmatpush.msra.mxu3 %v1668_v40  ;;  %v1269_v48 = vld [vmem:[%s2000_s2 + $0x2] sm:$0x3] }
  0x1c   :  { %279 = vmatpush.msrb.mxu1 %v1602_v6  ;;  %235 = vmatpush.msra.mxu2 %v1673_v41 }
  0x1d   :  { %136 = vmatpush.msra.mxu0 %v104_v10  ;;  %260 = vmatpush.msra.mxu3 %v1675_v42 }
  0x1e   :  { %280 = vmatpush.msrb.mxu1 %v1605_v12  ;;  %236 = vmatpush.msra.mxu2 %v1683_v43 }
  0x1f   :  { %137 = vmatpush.msra.mxu0 %v103_v11  ;;  %261 = vmatpush.msra.mxu3 %v1685_v44 }
  0x20   :  { %281 = vmatpush.msrb.mxu1 %v1608_v13  ;;  %1271 = vmatmul.msk.f32.vlgmr.msra.gmra.mxu2 %vm165_vm0, %v1268_v45 }
  0x21   :  { %524 = vmatpush.msrb.mxu0 %v1599_v5  ;;  %383 = vmatpush.msrb.mxu3 %v1664_v39 }
  0x22   :  { %403 = vmatpush.msra.mxu1 %v1599_v5  ;;  %357 = vmatpush.msrb.mxu2 %v1657_v37 }
  0x23   :  { %525 = vmatpush.msrb.mxu0 %v1602_v6  ;;  %384 = vmatpush.msrb.mxu3 %v1668_v40 }
  0x24   :  { %404 = vmatpush.msra.mxu1 %v1602_v6  ;;  %358 = vmatpush.msrb.mxu2 %v1662_v38 }
  0x25   :  { %526 = vmatpush.msrb.mxu0 %v1605_v12  ;;  %385 = vmatpush.msrb.mxu3 %v1675_v42 }
  0x26   :  { %405 = vmatpush.msra.mxu1 %v1605_v12  ;;  %359 = vmatpush.msrb.mxu2 %v1673_v41 }
  0x27   :  { %527 = vmatpush.msrb.mxu0 %v1608_v13  ;;  %386 = vmatpush.msrb.mxu3 %v1685_v44 }
  0x28   :  { %406 = vmatpush.msra.mxu1 %v1608_v13  ;;  %360 = vmatpush.msrb.mxu2 %v1683_v43 }
  0x2a   :  { %478 = vmatpush.msra.mxu2 %v1657_v37 }
  0x2c   :  { %479 = vmatpush.msra.mxu2 %v1662_v38 }
  0x2e   :  { %480 = vmatpush.msra.mxu2 %v1673_v41 }
  0x30   :  { %481 = vmatpush.msra.mxu2 %v1683_v43 }
  0x84   :  { %v93_v18 = vpop.permute.xlu0 %92 }
  0x85   :  { %vm97_vm2 = vcmp.eq.s32.totalorder %v1631_v17, %v93_v18 }
  0x86   :  { %v1264_v20 = vsel %vm97_vm2, 1.0, %v1516_v19 }
  0x87   :  { %1266 = vmatmul.msk.f32.vlgmr.msra.gmra.mxu0 %vm115_vm1, %v1264_v20 }
  0x88   :  { %v196_v32 = vpop.permute.xlu1 %195  ;;  %717 = vmatpush.msra.mxu0 %v1657_v37 }
  0x8a   :  { %718 = vmatpush.msra.mxu0 %v1662_v38 }
  0x8c   :  { %719 = vmatpush.msra.mxu0 %v1673_v41 }
  0x8e   :  { %720 = vmatpush.msra.mxu0 %v1683_v43 }
  0x96   :  { %v186_v23 = vpop.f32.mrf.mxu1 }
  0xa3   :  { %v238_v52 = vpop.f32.mrf.mxu2 }
  0xa4   :  { %v239_v55 = vadd.f32 %v1728_v50, %v238_v52 }
 0x104   :  { %v139_v22 = vpop.f32.mrf.mxu0 }
 0x105   :  { %v1642_v24 = vadd.f32 %v1639_v21, %v139_v22 }
 0x107   :  { %v189_v25 = vadd.f32 %v186_v23, %v1642_v24 }
 0x109   :  { %1315 = vtanh.f32 %v189_v25 }
 0x10f   :  { %v1316_v26 = vpop.eup %1315 }
 0x110   :  { %v191_v27 = vmul.f32 0.5, %v1316_v26 }
 0x112   :  { %v192_v28 = vadd.f32 0.5, %v191_v27 }
 0x114   :  { %v193_v29 = vsel %vm164_vm3, %v192_v28, %v1316_v26 }
 0x115   :  { %200 = vrot.lane.b32.xlu0 %v193_v29, %s1515_s25  ;;  %v198_v33 = vmul.f32 %v196_v32, %v193_v29 }
 0x187   :  { %v201_v30 = vpop.permute.xlu0 %200 }
 0x188   :  { %v203_v31 = vmul.f32 %v201_v30, %v193_v29 }
 0x18a   :  { %205 = vrot.lane.b32.xlu1 %v203_v31, %s1515_s25 }
 0x1fc   :  { %v206_v34 = vpop.permute.xlu1 %205 }
 0x1fd   :  { %v1650_v35 = vadd.f32 %v206_v34, %v198_v33 }
 0x1ff   :  { %1317 = vtanh.f32 %v1650_v35  ;;  %v321_v8 = vrot.slane %v1650_v35, 6 }
 0x205   :  { %v1318_v36 = vpop.eup %1317 }
 0x206   :  { %211 = vrot.lane.b32.xlu2 %v1318_v36, %s1515_s25 }
 0x260   :  { %v212_v46 = vpop.permute.xlu2 %211 }
 0x261   :  { %v214_v47 = vmul.f32 %v212_v46, %v193_v29 }
 0x263   :  { %242 = vrot.lane.b32.xlu2 %v214_v47, %s1517_s1 }
 0x26b   :  { %292 = vrot.lane.b32.xlu2 %v1269_v48, %s1515_s25 }
 0x2bd   :  { %v243_v49 = vpop.permute.xlu2 %242 }
 0x2be   :  { %1272 = vmatmul.msk.f32.vlgmr.msra.gmra.mxu3 %vm165_vm0, %v243_v49  ;;  %1273 = vmatmul.msk.f32.vlgmr.msrb.gmra.mxu1 %vm165_vm0, %v243_v49 }
 0x2bf   :  { %504 = vmatpush.msra.mxu3 %v1664_v39  ;;  %599 = vmatpush.msrb.mxu1 %v1657_v37 }
 0x2c1   :  { %505 = vmatpush.msra.mxu3 %v1668_v40  ;;  %600 = vmatpush.msrb.mxu1 %v1662_v38 }
 0x2c3   :  { %506 = vmatpush.msra.mxu3 %v1675_v42  ;;  %601 = vmatpush.msrb.mxu1 %v1673_v41 }
 0x2c5   :  { %507 = vmatpush.msra.mxu3 %v1685_v44  ;;  %602 = vmatpush.msrb.mxu1 %v1683_v43  ;;  %v293_v10 = vpop.permute.xlu2 %292 }
 0x33b   :  { %v283_v51 = vpop.f32.mrf.mxu1 }
 0x33c   :  { %v313_v53 = vrot.slane %v283_v51, 6 }
 0x33e   :  { %v315_v54 = vadd.f32 %v313_v53, %v1642_v24 }
 0x340   :  { %1319 = vtanh.f32 %v315_v54 }
 0x341   :  { %v263_v56 = vpop.f32.mrf.mxu3 }
 0x342   :  { %v286_v57 = vadd.f32 %v263_v56, %v239_v55 }
 0x344   :  { %1321 = vtanh.f32 %v286_v57 }
 0x346   :  { %v1320_v58 = vpop.eup %1319 }
 0x347   :  { %v317_v59 = vmul.f32 0.5, %v1320_v58 }
 0x349   :  { %v318_v60 = vadd.f32 0.5, %v317_v59  ;;  %v88_v59 = vld [vmem:[%s1998_s0 + $0x8] sm:$0xff]  ;;  %s1518_s0 = smov 96  }
 0x34a   :  { %v1322_v61 = vpop.eup %1321 }
 0x34b   :  { %v288_v62 = vmul.f32 0.5, %v1322_v61  ;;  %v319_v63 = vsel %vm164_vm3, %v318_v60, %v1320_v58 }
 0x34c   :  { %325 = vrot.lane.b32.xlu0 %v319_v63, %s1515_s25  ;;  %v323_v9 = vmul.f32 %v321_v8, %v319_v63 }
 0x34d   :  { %v289_v0 = vadd.f32 0.5, %v288_v62 }
 0x34f   :  { %v290_v1 = vsel %vm164_vm3, %v289_v0, %v1322_v61 }
 0x350   :  { %297 = vrot.lane.b32.xlu1 %v290_v1, %s1515_s25  ;;  %v295_v15 = vmul.f32 %v293_v10, %v290_v1 }
 0x3be   :  { %v326_v2 = vpop.permute.xlu0 %325 }
 0x3bf   :  { %v328_v3 = vmul.f32 %v326_v2, %v319_v63 }
 0x3c1   :  { %330 = vrot.lane.b32.xlu0 %v328_v3, %s1515_s25 }
 0x3c2   :  { %v298_v4 = vpop.permute.xlu1 %297 }
 0x3c3   :  { %v300_v7 = vmul.f32 %v298_v4, %v290_v1 }
 0x3c5   :  { %302 = vrot.lane.b32.xlu1 %v300_v7, %s1515_s25 }
 0x433   :  { %v331_v11 = vpop.permute.xlu0 %330 }
 0x434   :  { %v1741_v14 = vadd.f32 %v331_v11, %v323_v9 }
 0x436   :  { %1323 = vtanh.f32 %v1741_v14  ;;  %v442_v60 = vrot.slane %v1741_v14, 6 }
 0x437   :  { %v303_v16 = vpop.permute.xlu1 %302 }
 0x438   :  { %v1744_v18 = vadd.f32 %v303_v16, %v295_v15 }
 0x43a   :  { %1325 = vtanh.f32 %v1744_v18 }
 0x43c   :  { %v1324_v20 = vpop.eup %1323 }
 0x43d   :  { %336 = vrot.lane.b32.xlu2 %v1324_v20, %s1515_s25 }
 0x440   :  { %v1326_v22 = vpop.eup %1325 }
 0x441   :  { %308 = vrot.lane.b32.xlu0 %v1326_v22, %s1515_s25 }
 0x497   :  { %v337_v23 = vpop.permute.xlu2 %336 }
 0x498   :  { %v339_v25 = vmul.f32 %v337_v23, %v319_v63 }
 0x49a   :  { %v366_v26 = vrot.slane %v339_v25, 2 }
 0x49c   :  { %367 = vrot.lane.b32.xlu2 %v366_v26, %s1517_s1 }
 0x4b3   :  { %v309_v27 = vpop.permute.xlu0 %308 }
 0x4b4   :  { %v1750_v28 = vmul.f32 %v309_v27, %v290_v1 }
 0x4b6   :  { %341 = vrot.lane.b32.xlu1 %v1750_v28, %s1517_s1 }
 0x4f6   :  { %v368_v29 = vpop.permute.xlu2 %367 }
 0x4f7   :  { %1275 = vmatmul.msk.f32.vlgmr.msrb.gmra.mxu3 %vm165_vm0, %v368_v29  ;;  %1276 = vmatmul.msk.f32.vlgmr.msra.gmra.mxu1 %vm165_vm0, %v368_v29 }
 0x4f8   :  { %645 = vmatpush.msrb.mxu3 %v1599_v5  ;;  %742 = vmatpush.msra.mxu1 %v1664_v39 }
 0x4fa   :  { %646 = vmatpush.msrb.mxu3 %v1602_v6  ;;  %743 = vmatpush.msra.mxu1 %v1668_v40 }
 0x4fc   :  { %647 = vmatpush.msrb.mxu3 %v1605_v12  ;;  %744 = vmatpush.msra.mxu1 %v1675_v42 }
 0x4fe   :  { %648 = vmatpush.msrb.mxu3 %v1608_v13  ;;  %745 = vmatpush.msra.mxu1 %v1685_v44 }
 0x528   :  { %v342_v30 = vpop.permute.xlu1 %341 }
 0x529   :  { %1274 = vmatmul.msk.f32.vlgmr.msrb.gmra.mxu2 %vm165_vm0, %v342_v30 }
 0x52a   :  { %625 = vmatpush.msrb.mxu2 %v1664_v39 }
 0x52c   :  { %626 = vmatpush.msrb.mxu2 %v1668_v40 }
 0x52e   :  { %627 = vmatpush.msrb.mxu2 %v1675_v42 }
 0x530   :  { %628 = vmatpush.msrb.mxu2 %v1685_v44 }
 0x574   :  { %v408_v31 = vpop.f32.mrf.mxu1 }
 0x575   :  { %v434_v32 = vrot.slane %v408_v31, 4 }
 0x577   :  { %v436_v33 = vadd.f32 %v434_v32, %v1642_v24 }
 0x579   :  { %1327 = vtanh.f32 %v436_v33 }
 0x57a   :  { %v388_v48 = vpop.f32.mrf.mxu3 }
 0x57f   :  { %v1328_v34 = vpop.eup %1327 }
 0x580   :  { %v438_v35 = vmul.f32 0.5, %v1328_v34 }
 0x582   :  { %v439_v36 = vadd.f32 0.5, %v438_v35 }
 0x584   :  { %v440_v45 = vsel %vm164_vm3, %v439_v36, %v1328_v34 }
 0x585   :  { %446 = vrot.lane.b32.xlu0 %v440_v45, %s1515_s25  ;;  %v444_v61 = vmul.f32 %v442_v60, %v440_v45 }
 0x5ac   :  { %v362_v46 = vpop.f32.mrf.mxu2 }
 0x5ad   :  { %v363_v47 = vadd.f32 %v1728_v50, %v362_v46 }
 0x5af   :  { %v411_v49 = vadd.f32 %v388_v48, %v363_v47 }
 0x5b1   :  { %1329 = vtanh.f32 %v411_v49 }
 0x5b7   :  { %v1330_v51 = vpop.eup %1329 }
 0x5b8   :  { %v413_v52 = vmul.f32 0.5, %v1330_v51 }
 0x5ba   :  { %v414_v53 = vadd.f32 0.5, %v413_v52 }
 0x5bc   :  { %v415_v54 = vsel %vm164_vm3, %v414_v53, %v1330_v51 }
 0x5bd   :  { %418 = vrot.lane.b32.xlu1 %v415_v54, %s1515_s25  ;;  %v416_v1 = vmul.f32 %v415_v54, %v1744_v18 }
 0x5f7   :  { %v447_v55 = vpop.permute.xlu0 %446 }
 0x5f8   :  { %v449_v56 = vmul.f32 %v447_v55, %v440_v45 }
 0x5fa   :  { %451 = vrot.lane.b32.xlu2 %v449_v56, %s1515_s25 }
 0x62f   :  { %v419_v57 = vpop.permute.xlu1 %418 }
 0x630   :  { %v421_v58 = vmul.f32 %v419_v57, %v415_v54 }
 0x632   :  { %423 = vrot.lane.b32.xlu0 %v421_v58, %s1515_s25 }
 0x63a   :  { %95 = vperm.xlu0 %1311, %v88_v59  }
 0x654   :  { %v452_v62 = vpop.permute.xlu2 %451 }
 0x655   :  { %v1783_v63 = vadd.f32 %v452_v62, %v444_v61 }
 0x657   :  { %1331 = vtanh.f32 %v1783_v63  ;;  %v563_v49 = vrot.slane %v1783_v63, 6 }
 0x65d   :  { %v1332_v0 = vpop.eup %1331 }
 0x65e   :  { %457 = vrot.lane.b32.xlu1 %v1332_v0, %s1515_s25 }
 0x6a4   :  { %v424_v2 = vpop.permute.xlu0 %423 }
 0x6a5   :  { %v1788_v3 = vadd.f32 %v424_v2, %v416_v1 }
 0x6a7   :  { %1333 = vtanh.f32 %v1788_v3 }
 0x6ac   :  { %v96_v4 = vpop.permute.xlu0 %95 }
 0x6ad   :  { %v1334_v7 = vpop.eup %1333  ;;  %vm98_vm4 = vcmp.eq.s32.totalorder %v1631_v17, %v96_v4 }
 0x6ae   :  { %v1265_v8 = vsel %vm98_vm4, 1.0, %v1516_v19  ;;  %429 = vrot.lane.b32.xlu2 %v1334_v7, %s1515_s25 }
 0x6af   :  { %1267 = vmatmul.msk.f32.gmra.mxu0 %vm115_vm1, %v1265_v8 }
 0x6d0   :  { %v458_v9 = vpop.permute.xlu1 %457 }
 0x6d1   :  { %v460_v10 = vmul.f32 %v458_v9, %v440_v45 }
 0x6d3   :  { %v487_v11 = vrot.slane %v460_v10, 4 }
 0x6d5   :  { %488 = vrot.lane.b32.xlu1 %v487_v11, %s1517_s1 }
 0x708   :  { %v430_v14 = vpop.permute.xlu2 %429 }
 0x709   :  { %v1796_v15 = vmul.f32 %v430_v14, %v415_v54 }
 0x70b   :  { %462 = vrot.lane.b32.xlu2 %v1796_v15, %s1517_s1  ;;  %v1135_v62 = vrot.slane %v1796_v15, 6 }
 0x70d   :  { %v1149_v2 = vsel %vm1148_vm5, %v1750_v28, %v1135_v62 }
 0x72c   :  { %v1815_v18 = vpop.f32.mrf.mxu0 }
 0x72d   :  { %v1862_v7 = vadd.f32 %v1639_v21, %v1815_v18 }
 0x747   :  { %v489_v16 = vpop.permute.xlu1 %488 }
 0x748   :  { %1278 = vmatmul.msk.f32.vlgmr.msra.gmra.mxu3 %vm165_vm0, %v489_v16  ;;  %1279 = vmatmul.msk.f32.vlgmr.msrb.gmra.mxu0 %vm165_vm0, %v489_v16 }
 0x749   :  { %863 = vmatpush.msrb.mxu0 %v1664_v39  ;;  %837 = vmatpush.msra.mxu3 %v1657_v37 }
 0x74b   :  { %864 = vmatpush.msrb.mxu0 %v1668_v40  ;;  %838 = vmatpush.msra.mxu3 %v1662_v38 }
 0x74d   :  { %865 = vmatpush.msrb.mxu0 %v1675_v42  ;;  %839 = vmatpush.msra.mxu3 %v1673_v41 }
 0x74f   :  { %866 = vmatpush.msrb.mxu0 %v1685_v44  ;;  %840 = vmatpush.msra.mxu3 %v1683_v43 }
 0x765   :  { %v463_v19 = vpop.permute.xlu2 %462 }
 0x766   :  { %1277 = vmatmul.msk.f32.vlgmr.msra.gmra.mxu2 %vm165_vm0, %v463_v19 }
 0x767   :  { %762 = vmatpush.msra.mxu2 %v1599_v5 }
 0x769   :  { %763 = vmatpush.msra.mxu2 %v1602_v6 }
 0x76b   :  { %764 = vmatpush.msra.mxu2 %v1605_v12 }
 0x76d   :  { %765 = vmatpush.msra.mxu2 %v1608_v13 }
 0x7c5   :  { %v529_v20 = vpop.f32.mrf.mxu0 }
 0x7c6   :  { %v555_v22 = vrot.slane %v529_v20, 2 }
 0x7c8   :  { %v557_v23 = vadd.f32 %v555_v22, %v1642_v24 }
 0x7ca   :  { %1335 = vtanh.f32 %v557_v23 }
 0x7cb   :  { %v509_v32 = vpop.f32.mrf.mxu3 }
 0x7d0   :  { %v1336_v25 = vpop.eup %1335 }
 0x7d1   :  { %v559_v26 = vmul.f32 0.5, %v1336_v25 }
 0x7d3   :  { %v560_v27 = vadd.f32 0.5, %v559_v26 }
 0x7d5   :  { %v561_v29 = vsel %vm164_vm3, %v560_v27, %v1336_v25 }
 0x7d6   :  { %567 = vrot.lane.b32.xlu0 %v561_v29, %s1515_s25  ;;  %v565_v51 = vmul.f32 %v563_v49, %v561_v29 }
 0x7e9   :  { %v483_v30 = vpop.f32.mrf.mxu2 }
 0x7ea   :  { %v484_v31 = vadd.f32 %v1728_v50, %v483_v30 }
 0x7ec   :  { %v532_v33 = vadd.f32 %v509_v32, %v484_v31 }
 0x7ee   :  { %1337 = vtanh.f32 %v532_v33 }
 0x7f4   :  { %v1338_v34 = vpop.eup %1337 }
 0x7f5   :  { %v534_v35 = vmul.f32 0.5, %v1338_v34 }
 0x7f7   :  { %v535_v36 = vadd.f32 0.5, %v534_v35 }
 0x7f9   :  { %v536_v24 = vsel %vm164_vm3, %v535_v36, %v1338_v34 }
 0x7fa   :  { %539 = vrot.lane.b32.xlu1 %v536_v24, %s1515_s25  ;;  %v537_v55 = vmul.f32 %v536_v24, %v1788_v3 }
 0x848   :  { %v568_v45 = vpop.permute.xlu0 %567 }
 0x849   :  { %v570_v46 = vmul.f32 %v568_v45, %v561_v29 }
 0x84b   :  { %572 = vrot.lane.b32.xlu2 %v570_v46, %s1515_s25 }
 0x86c   :  { %v540_v47 = vpop.permute.xlu1 %539 }
 0x86d   :  { %v542_v48 = vmul.f32 %v540_v47, %v536_v24 }
 0x86f   :  { %544 = vrot.lane.b32.xlu0 %v542_v48, %s1515_s25 }
 0x8a5   :  { %v573_v52 = vpop.permute.xlu2 %572 }
 0x8a6   :  { %v1828_v53 = vadd.f32 %v573_v52, %v565_v51 }
 0x8a8   :  { %1339 = vtanh.f32 %v1828_v53  ;;  %v681_v31 = vrot.slane %v1828_v53, 6 }
 0x8ae   :  { %v1340_v54 = vpop.eup %1339 }
 0x8af   :  { %578 = vrot.lane.b32.xlu1 %v1340_v54, %s1515_s25 }
 0x8e1   :  { %v545_v56 = vpop.permute.xlu0 %544 }
 0x8e2   :  { %v1833_v57 = vadd.f32 %v545_v56, %v537_v55 }
 0x8e4   :  { %1341 = vtanh.f32 %v1833_v57 }
 0x8ea   :  { %v1342_v58 = vpop.eup %1341 }
 0x8eb   :  { %550 = vrot.lane.b32.xlu2 %v1342_v58, %s1515_s25 }
 0x921   :  { %v579_v59 = vpop.permute.xlu1 %578 }
 0x922   :  { %v581_v60 = vmul.f32 %v579_v59, %v561_v29 }
 0x924   :  { %v608_v61 = vrot.slane %v581_v60, 6 }
 0x926   :  { %609 = vrot.lane.b32.xlu0 %v608_v61, %s1517_s1 }
 0x945   :  { %v551_v63 = vpop.permute.xlu2 %550 }
 0x946   :  { %v553_v0 = vmul.f32 %v551_v63, %v536_v24 }
 0x948   :  { %v1137_v1 = vrot.slane %v553_v0, 4  ;;  %583 = vrot.lane.b32.xlu1 %v553_v0, %s1517_s1 }
 0x94a   :  { %v1843_v3 = vsel %vm1150_vm6, %v1149_v2, %v1137_v1 }
 0x998   :  { %v610_v4 = vpop.permute.xlu0 %609 }
 0x999   :  { %1281 = vmatmul.msk.f32.vlgmr.msrb.gmra.mxu2 %vm165_vm0, %v610_v4  ;;  %1282 = vmatmul.msk.f32.vlgmr.msrb.gmra.mxu3 %vm165_vm0, %v610_v4 }
 0x99a   :  { %984 = vmatpush.msrb.mxu3 %v1664_v39  ;;  %958 = vmatpush.msrb.mxu2 %v1657_v37 }
 0x99c   :  { %985 = vmatpush.msrb.mxu3 %v1668_v40  ;;  %959 = vmatpush.msrb.mxu2 %v1662_v38 }
 0x99e   :  { %986 = vmatpush.msrb.mxu3 %v1675_v42  ;;  %960 = vmatpush.msrb.mxu2 %v1673_v41 }
 0x9a0   :  { %987 = vmatpush.msrb.mxu3 %v1685_v44  ;;  %961 = vmatpush.msrb.mxu2 %v1683_v43 }
 0x9ba   :  { %v584_v28 = vpop.permute.xlu1 %583 }
 0x9bb   :  { %1280 = vmatmul.msk.f32.vlgmr.msrb.gmra.mxu1 %vm165_vm0, %v584_v28 }
 0x9bc   :  { %883 = vmatpush.msrb.mxu1 %v1599_v5 }
 0x9be   :  { %884 = vmatpush.msrb.mxu1 %v1602_v6 }
 0x9c0   :  { %885 = vmatpush.msrb.mxu1 %v1605_v12 }
 0x9c2   :  { %886 = vmatpush.msrb.mxu1 %v1608_v13 }
 0xa1c   :  { %v650_v8 = vpop.f32.mrf.mxu3  ;;  %v630_v20 = vpop.f32.mrf.mxu2 }
 0xa1d   :  { %v675_v9 = vadd.f32 %v650_v8, %v1862_v7 }
 0xa1f   :  { %1343 = vtanh.f32 %v675_v9 }
 0xa25   :  { %v1344_v10 = vpop.eup %1343 }
 0xa26   :  { %v677_v11 = vmul.f32 0.5, %v1344_v10 }
 0xa28   :  { %v678_v14 = vadd.f32 0.5, %v677_v11 }
 0xa2a   :  { %v679_v15 = vsel %vm164_vm3, %v678_v14, %v1344_v10 }
 0xa2b   :  { %685 = vrot.lane.b32.xlu2 %v679_v15, %s1515_s25  ;;  %v683_v32 = vmul.f32 %v681_v31, %v679_v15 }
 0xa38   :  { %v604_v16 = vpop.f32.mrf.mxu1 }
 0xa39   :  { %v605_v19 = vadd.f32 %v1728_v50, %v604_v16 }
 0xa3b   :  { %v653_v22 = vadd.f32 %v630_v20, %v605_v19 }
 0xa3d   :  { %1345 = vtanh.f32 %v653_v22 }
 0xa43   :  { %v1346_v21 = vpop.eup %1345 }
 0xa44   :  { %v655_v18 = vmul.f32 0.5, %v1346_v21 }
 0xa46   :  { %v656_v23 = vadd.f32 0.5, %v655_v18 }
 0xa48   :  { %v657_v25 = vsel %vm164_vm3, %v656_v23, %v1346_v21 }
 0xa49   :  { %660 = vrot.lane.b32.xlu0 %v657_v25, %s1515_s25  ;;  %v658_v36 = vmul.f32 %v657_v25, %v1833_v57 }
 0xa85   :  { %v686_v26 = vpop.permute.xlu2 %685 }
 0xa86   :  { %v688_v27 = vmul.f32 %v686_v26, %v679_v15 }
 0xa88   :  { %690 = vrot.lane.b32.xlu1 %v688_v27, %s1515_s25 }
 0xabb   :  { %v661_v29 = vpop.permute.xlu0 %660 }
 0xabc   :  { %v663_v30 = vmul.f32 %v661_v29, %v657_v25 }
 0xabe   :  { %665 = vrot.lane.b32.xlu2 %v663_v30, %s1515_s25 }
 0xafa   :  { %v691_v33 = vpop.permute.xlu1 %690 }
 0xafb   :  { %v1875_v34 = vadd.f32 %v691_v33, %v683_v32 }
 0xafd   :  { %1347 = vtanh.f32 %v1875_v34  ;;  %v801_v63 = vrot.slane %v1875_v34, 6 }
 0xb03   :  { %v1348_v35 = vpop.eup %1347 }
 0xb04   :  { %696 = vrot.lane.b32.xlu0 %v1348_v35, %s1515_s25 }
 0xb18   :  { %v666_v24 = vpop.permute.xlu2 %665 }
 0xb19   :  { %v668_v45 = vadd.f32 %v666_v24, %v658_v36 }
 0xb1b   :  { %1349 = vtanh.f32 %v668_v45 }
 0xb21   :  { %v1350_v46 = vpop.eup %1349 }
 0xb22   :  { %671 = vrot.lane.b32.xlu1 %v1350_v46, %s1515_s25 }
 0xb76   :  { %v697_v47 = vpop.permute.xlu0 %696 }
 0xb77   :  { %v699_v48 = vmul.f32 %v697_v47, %v679_v15 }
 0xb79   :  { %726 = vrot.lane.b32.xlu2 %v699_v48, %s1517_s1 }
 0xb94   :  { %v672_v49 = vpop.permute.xlu1 %671 }
 0xb95   :  { %v674_v51 = vmul.f32 %v672_v49, %v657_v25 }
 0xb97   :  { %v1139_v52 = vrot.slane %v674_v51, 2  ;;  %701 = vrot.lane.b32.xlu0 %v674_v51, %s1517_s1 }
 0xb99   :  { %v1885_v53 = vsel %vm1152_vm7, %v1843_v3, %v1139_v52 }
 0xbd3   :  { %v727_v54 = vpop.permute.xlu2 %726 }
 0xbd4   :  { %1284 = vmatmul.msk.f32.vlgmr.msra.gmra.mxu1 %vm165_vm0, %v727_v54  ;;  %1285 = vmatmul.msk.f32.vlgmr.msra.gmra.mxu2 %vm165_vm0, %v727_v54 }
 0xbd5   :  { %1105 = vmatpush.msra.mxu2 %v1664_v39  ;;  %1079 = vmatpush.msra.mxu1 %v1657_v37 }
 0xbd7   :  { %1106 = vmatpush.msra.mxu2 %v1668_v40  ;;  %1080 = vmatpush.msra.mxu1 %v1662_v38 }
 0xbd9   :  { %1107 = vmatpush.msra.mxu2 %v1675_v42  ;;  %1081 = vmatpush.msra.mxu1 %v1673_v41 }
 0xbdb   :  { %1108 = vmatpush.msra.mxu2 %v1685_v44  ;;  %1082 = vmatpush.msra.mxu1 %v1683_v43 }
 0xc09   :  { %v702_v55 = vpop.permute.xlu0 %701 }
 0xc0a   :  { %1283 = vmatmul.msk.f32.vlgmr.msra.gmra.mxu0 %vm165_vm0, %v702_v55 }
 0xc0b   :  { %1004 = vmatpush.msra.mxu0 %v1599_v5 }
 0xc0d   :  { %1005 = vmatpush.msra.mxu0 %v1602_v6 }
 0xc0f   :  { %1006 = vmatpush.msra.mxu0 %v1605_v12 }
 0xc11   :  { %1007 = vmatpush.msra.mxu0 %v1608_v13 }
 0xc51   :  { %v747_v44 = vpop.f32.mrf.mxu1 }
 0xc57   :  { %v767_v37 = vpop.f32.mrf.mxu2 }
 0xc58   :  { %v793_v38 = vrot.slane %v767_v37, 6 }
 0xc5a   :  { %v795_v39 = vadd.f32 %v793_v38, %v1862_v7 }
 0xc5c   :  { %1351 = vtanh.f32 %v795_v39 }
 0xc62   :  { %v1352_v40 = vpop.eup %1351 }
 0xc63   :  { %v797_v41 = vmul.f32 0.5, %v1352_v40 }
 0xc65   :  { %v798_v42 = vadd.f32 0.5, %v797_v41 }
 0xc67   :  { %v799_v43 = vsel %vm164_vm3, %v798_v42, %v1352_v40 }
 0xc68   :  { %805 = vrot.lane.b32.xlu2 %v799_v43, %s1515_s25  ;;  %v803_v0 = vmul.f32 %v801_v63, %v799_v43 }
 0xc87   :  { %v722_v5 = vpop.f32.mrf.mxu0 }
 0xc88   :  { %v723_v6 = vadd.f32 %v1728_v50, %v722_v5 }
 0xc8a   :  { %v770_v12 = vadd.f32 %v747_v44, %v723_v6 }
 0xc8c   :  { %1353 = vtanh.f32 %v770_v12 }
 0xc92   :  { %v1354_v13 = vpop.eup %1353 }
 0xc93   :  { %v772_v56 = vmul.f32 0.5, %v1354_v13 }
 0xc95   :  { %v773_v57 = vadd.f32 0.5, %v772_v56 }
 0xc97   :  { %v774_v58 = vsel %vm164_vm3, %v773_v57, %v1354_v13 }
 0xc98   :  { %777 = vrot.lane.b32.xlu1 %v774_v58, %s1515_s25  ;;  %v775_v4 = vmul.f32 %v774_v58, %v668_v45 }
 0xcc2   :  { %v806_v59 = vpop.permute.xlu2 %805 }
 0xcc3   :  { %v808_v60 = vmul.f32 %v806_v59, %v799_v43 }
 0xcc5   :  { %810 = vrot.lane.b32.xlu1 %v808_v60, %s1515_s25 }
 0xd0a   :  { %v778_v61 = vpop.permute.xlu1 %777 }
 0xd0b   :  { %v780_v62 = vmul.f32 %v778_v61, %v774_v58 }
 0xd0d   :  { %782 = vrot.lane.b32.xlu0 %v780_v62, %s1515_s25 }
 0xd37   :  { %v811_v1 = vpop.permute.xlu1 %810 }
 0xd38   :  { %v813_v2 = vadd.f32 %v811_v1, %v803_v0 }
 0xd3a   :  { %1355 = vtanh.f32 %v813_v2  ;;  %v922_v48 = vrot.slane %v813_v2, 6 }
 0xd40   :  { %v1356_v3 = vpop.eup %1355 }
 0xd41   :  { %816 = vrot.lane.b32.xlu0 %v1356_v3, %s1515_s25 }
 0xd7f   :  { %v783_v28 = vpop.permute.xlu0 %782 }
 0xd80   :  { %v785_v8 = vadd.f32 %v783_v28, %v775_v4 }
 0xd82   :  { %1357 = vtanh.f32 %v785_v8 }
 0xd88   :  { %v1358_v9 = vpop.eup %1357 }
 0xd89   :  { %788 = vrot.lane.b32.xlu2 %v1358_v9, %s1515_s25 }
 0xdb3   :  { %v817_v10 = vpop.permute.xlu0 %816 }
 0xdb4   :  { %v819_v11 = vmul.f32 %v817_v10, %v799_v43 }
 0xdb6   :  { %v846_v14 = vrot.slane %v819_v11, 2 }
 0xdb8   :  { %847 = vrot.lane.b32.xlu2 %v846_v14, %s1517_s1 }
 0xde3   :  { %v789_v15 = vpop.permute.xlu2 %788 }
 0xde4   :  { %v1916_v16 = vmul.f32 %v789_v15, %v774_v58 }
 0xde6   :  { %821 = vrot.lane.b32.xlu1 %v1916_v16, %s1517_s1 }
 0xe12   :  { %v848_v19 = vpop.permute.xlu2 %847 }
 0xe13   :  { %1287 = vmatmul.msk.f32.vlgmr.msrb.gmra.mxu0 %vm165_vm0, %v848_v19  ;;  %1288 = vmatmul.msk.f32.vlgmr.msrb.gmra.mxu1 %vm165_vm0, %v848_v19 }
 0xe58   :  { %v822_v20 = vpop.permute.xlu1 %821 }
 0xe59   :  { %1286 = vmatmul.msk.f32.vlgmr.msra.gmra.mxu3 %vm165_vm0, %v822_v20 }
 0xe90   :  { %v888_v22 = vpop.f32.mrf.mxu1  ;;  %v868_v31 = vpop.f32.mrf.mxu0 }
 0xe91   :  { %v914_v21 = vrot.slane %v888_v22, 4 }
 0xe93   :  { %v916_v18 = vadd.f32 %v914_v21, %v1862_v7 }
 0xe95   :  { %1359 = vtanh.f32 %v916_v18 }
 0xe9b   :  { %v1360_v23 = vpop.eup %1359 }
 0xe9c   :  { %v918_v25 = vmul.f32 0.5, %v1360_v23 }
 0xe9e   :  { %v919_v26 = vadd.f32 0.5, %v918_v25 }
 0xea0   :  { %v920_v27 = vsel %vm164_vm3, %v919_v26, %v1360_v23 }
 0xea1   :  { %926 = vrot.lane.b32.xlu0 %v920_v27, %s1515_s25  ;;  %v924_v49 = vmul.f32 %v922_v48, %v920_v27 }
 0xedc   :  { %v842_v29 = vpop.f32.mrf.mxu3 }
 0xedd   :  { %v843_v30 = vadd.f32 %v1728_v50, %v842_v29 }
 0xedf   :  { %v891_v32 = vadd.f32 %v868_v31, %v843_v30 }
 0xee1   :  { %1361 = vtanh.f32 %v891_v32 }
 0xee7   :  { %v1362_v33 = vpop.eup %1361 }
 0xee8   :  { %v893_v34 = vmul.f32 0.5, %v1362_v33 }
 0xeea   :  { %v894_v35 = vadd.f32 0.5, %v893_v34 }
 0xeec   :  { %v895_v36 = vsel %vm164_vm3, %v894_v35, %v1362_v33 }
 0xeed   :  { %898 = vrot.lane.b32.xlu1 %v895_v36, %s1515_s25  ;;  %v896_v55 = vmul.f32 %v895_v36, %v785_v8 }
 0xf13   :  { %v927_v24 = vpop.permute.xlu0 %926 }
 0xf14   :  { %v929_v45 = vmul.f32 %v927_v24, %v920_v27 }
 0xf16   :  { %931 = vrot.lane.b32.xlu2 %v929_v45, %s1515_s25 }
 0xf5f   :  { %v899_v46 = vpop.permute.xlu1 %898 }
 0xf60   :  { %v901_v47 = vmul.f32 %v899_v46, %v895_v36 }
 0xf62   :  { %903 = vrot.lane.b32.xlu0 %v901_v47, %s1515_s25 }
 0xf70   :  { %v932_v51 = vpop.permute.xlu2 %931 }
 0xf71   :  { %v934_v52 = vadd.f32 %v932_v51, %v924_v49  ;;  %v1160_v51 = vld [vmem:[#allocation7 + $0x18] sm:$0xff] }
 0xf72   :  { %1187 = vmatpush.msra.mxu3 %v1160_v51 }
 0xf73   :  { %1363 = vtanh.f32 %v934_v52  ;;  %v1043_v10 = vrot.slane %v934_v52, 6  ;;  %v1159_v52 = vld [vmem:[#allocation7 + $0x10] sm:$0xff] }
 0xf74   :  { %1188 = vmatpush.msra.mxu3 %v1159_v52 }
 0xf79   :  { %v1364_v54 = vpop.eup %1363 }
 0xf7a   :  { %937 = vrot.lane.b32.xlu1 %v1364_v54, %s1515_s25  ;;  %v1158_v54 = vld [vmem:[#allocation7 + $0x8] sm:$0xff] }
 0xf7b   :  { %1189 = vmatpush.msra.mxu3 %v1158_v54 }
 0xfd4   :  { %v904_v37 = vpop.permute.xlu0 %903 }
 0xfd5   :  { %v906_v38 = vadd.f32 %v904_v37, %v896_v55 }
 0xfd7   :  { %1365 = vtanh.f32 %v906_v38 }
 0xfdd   :  { %v1366_v39 = vpop.eup %1365 }
 0xfde   :  { %909 = vrot.lane.b32.xlu2 %v1366_v39, %s1515_s25 }
 0xfec   :  { %v938_v40 = vpop.permute.xlu1 %937 }
 0xfed   :  { %v940_v41 = vmul.f32 %v938_v40, %v920_v27 }
 0xfef   :  { %v967_v42 = vrot.slane %v940_v41, 4  ;;  %v1314_v41 = vld [vmem:[%s2007_s9] ss:$0 sm:$0xff]  ;;  %s1519_s9 = smov [#allocation9]  }
 0xff0   :  { %s1241_s23 = sshll.u32 %s1519_s9, 4  ;;  %s1242_s23 = int_to_ptr.vmem [resolvable:$true] %s1241_s23 }
 0xff1   :  { %968 = vrot.lane.b32.xlu1 %v967_v42, %s1517_s1 }
0x1038   :  { %v910_v43 = vpop.permute.xlu2 %909 }
0x1039   :  { %v912_v5 = vmul.f32 %v910_v43, %v895_v36 }
0x103b   :  { %942 = vrot.lane.b32.xlu0 %v912_v5, %s1517_s1  ;;  %v1141_v27 = vrot.slane %v912_v5, 6 }
0x103d   :  { %v1154_v32 = vsel %vm1148_vm5, %v1916_v16, %v1141_v27 }
0x1063   :  { %v969_v6 = vpop.permute.xlu1 %968 }
0x1064   :  { %1290 = vmatmul.msk.f32.vlgmr.msrb.gmra.mxu3 %vm165_vm0, %v969_v6  ;;  %1291 = vmatmul.msk.f32.vlgmr.msra.gmra.mxu0 %vm165_vm0, %v969_v6 }
0x10ad   :  { %v943_v44 = vpop.permute.xlu0 %942 }
0x10ae   :  { %1289 = vmatmul.msk.f32.vlgmr.msrb.gmra.mxu2 %vm165_vm0, %v943_v44 }
0x10e1   :  { %v1009_v12 = vpop.f32.mrf.mxu0 }
0x10e2   :  { %v1035_v13 = vrot.slane %v1009_v12, 2 }
0x10e4   :  { %v1037_v56 = vadd.f32 %v1035_v13, %v1862_v7 }
0x10e6   :  { %1367 = vtanh.f32 %v1037_v56 }
0x10e7   :  { %v989_v63 = vpop.f32.mrf.mxu3 }
0x10ec   :  { %v1368_v57 = vpop.eup %1367 }
0x10ed   :  { %v1039_v58 = vmul.f32 0.5, %v1368_v57 }
0x10ef   :  { %v1040_v59 = vadd.f32 0.5, %v1039_v58 }
0x10f1   :  { %v1041_v60 = vsel %vm164_vm3, %v1040_v59, %v1368_v57 }
0x10f2   :  { %1047 = vrot.lane.b32.xlu2 %v1041_v60, %s1515_s25  ;;  %v1045_v11 = vmul.f32 %v1043_v10, %v1041_v60 }
0x1131   :  { %v963_v61 = vpop.f32.mrf.mxu2 }
0x1132   :  { %v964_v62 = vadd.f32 %v1728_v50, %v963_v61 }
0x1134   :  { %v1012_v0 = vadd.f32 %v989_v63, %v964_v62 }
0x1136   :  { %1369 = vtanh.f32 %v1012_v0 }
0x113c   :  { %v1370_v1 = vpop.eup %1369 }
0x113d   :  { %v1014_v2 = vmul.f32 0.5, %v1370_v1 }
0x113f   :  { %v1015_v3 = vadd.f32 0.5, %v1014_v2 }
0x1141   :  { %v1016_v7 = vsel %vm164_vm3, %v1015_v3, %v1370_v1 }
0x1142   :  { %1019 = vrot.lane.b32.xlu0 %v1016_v7, %s1515_s25  ;;  %v1017_v20 = vmul.f32 %v1016_v7, %v906_v38 }
0x114c   :  { %v1048_v4 = vpop.permute.xlu2 %1047 }
0x114d   :  { %v1050_v28 = vmul.f32 %v1048_v4, %v1041_v60 }
0x114f   :  { %1052 = vrot.lane.b32.xlu1 %v1050_v28, %s1515_s25 }
0x11b4   :  { %v1020_v8 = vpop.permute.xlu0 %1019 }
0x11b5   :  { %v1022_v9 = vmul.f32 %v1020_v8, %v1016_v7 }
0x11b7   :  { %1024 = vrot.lane.b32.xlu2 %v1022_v9, %s1515_s25 }
0x11c1   :  { %v1053_v14 = vpop.permute.xlu1 %1052 }
0x11c2   :  { %v1950_v15 = vadd.f32 %v1053_v14, %v1045_v11 }
0x11c4   :  { %1371 = vtanh.f32 %v1950_v15 }
0x11ca   :  { %v1372_v19 = vpop.eup %1371 }
0x11cb   :  { %1058 = vrot.lane.b32.xlu0 %v1372_v19, %s1515_s25 }
0x1211   :  { %v1025_v22 = vpop.permute.xlu2 %1024 }
0x1212   :  { %v1027_v21 = vadd.f32 %v1025_v22, %v1017_v20 }
0x1214   :  { %1373 = vtanh.f32 %v1027_v21 }
0x121a   :  { %v1374_v18 = vpop.eup %1373 }
0x121b   :  { %1030 = vrot.lane.b32.xlu1 %v1374_v18, %s1515_s25 }
0x123d   :  { %v1059_v23 = vpop.permute.xlu0 %1058 }
0x123e   :  { %v1061_v25 = vmul.f32 %v1059_v23, %v1041_v60 }
0x1240   :  { %v1088_v26 = vrot.slane %v1061_v25, 6 }
0x1242   :  { %1089 = vrot.lane.b32.xlu2 %v1088_v26, %s1517_s1 }
0x128d   :  { %v1031_v29 = vpop.permute.xlu1 %1030 }
0x128e   :  { %v1033_v30 = vmul.f32 %v1031_v29, %v1016_v7 }
0x1290   :  { %v1143_v31 = vrot.slane %v1033_v30, 4  ;;  %1063 = vrot.lane.b32.xlu0 %v1033_v30, %s1517_s1 }
0x1292   :  { %v1155_v33 = vsel %vm1150_vm6, %v1154_v32, %v1143_v31 }
0x129c   :  { %v1090_v34 = vpop.permute.xlu2 %1089 }
0x129d   :  { %1293 = vmatmul.msk.f32.vlgmr.msra.gmra.mxu2 %vm165_vm0, %v1090_v34 }
0x1302   :  { %v1064_v35 = vpop.permute.xlu0 %1063 }
0x1303   :  { %1292 = vmatmul.msk.f32.vlgmr.msra.gmra.mxu1 %vm165_vm0, %v1064_v35 }
0x1320   :  { %v1110_v45 = vpop.f32.mrf.mxu2 }
0x1380   :  { %v1084_v36 = vpop.f32.mrf.mxu1 }
0x1381   :  { %v1085_v24 = vadd.f32 %v1728_v50, %v1084_v36  ;;  %v1157_v50 = vld [vmem:[#allocation7] sm:$0xff] }
0x1382   :  { %1190 = vmatpush.msra.mxu3 %v1157_v50 }
0x1383   :  { %v1113_v46 = vadd.f32 %v1110_v45, %v1085_v24 }
0x1385   :  { %1375 = vtanh.f32 %v1113_v46 }
0x138b   :  { %v1376_v47 = vpop.eup %1375 }
0x138c   :  { %v1115_v48 = vmul.f32 0.5, %v1376_v47 }
0x138e   :  { %v1116_v49 = vadd.f32 0.5, %v1115_v48 }
0x1390   :  { %v1117_v16 = vsel %vm164_vm3, %v1116_v49, %v1376_v47 }
0x1391   :  { %1120 = vrot.lane.b32.xlu1 %v1117_v16, %s1515_s25  ;;  %v1118_v17 = vmul.f32 %v1117_v16, %v1027_v21 }
0x1399   :  { %1167 = vrot.lane.b32.xlu1 %v1885_v53, %s1517_s1 }
0x1403   :  { %v1121_v55 = vpop.permute.xlu1 %1120 }
0x1404   :  { %v1123_v37 = vmul.f32 %v1121_v55, %v1117_v16 }
0x1406   :  { %1125 = vrot.lane.b32.xlu2 %v1123_v37, %s1515_s25 }
0x140b   :  { %v1168_v38 = vpop.permute.xlu1 %1167 }
0x140c   :  { %1294 = vmatmul.msk.f32.vlgmr.msra.gmra.mxu3 %vm165_vm0, %v1168_v38 }
0x1460   :  { %v1126_v39 = vpop.permute.xlu2 %1125 }
0x1461   :  { %v1128_v40 = vadd.f32 %v1126_v39, %v1118_v17 }
0x1463   :  { %1377 = vtanh.f32 %v1128_v40 }
0x1469   :  { %v1378_v53 = vpop.eup %1377 }
0x146a   :  { %1131 = vrot.lane.b32.xlu0 %v1378_v53, %s1515_s25 }
0x1472   :  { %1200 = vrot.lane.b32.xlu0 %v1061_v25, %s1517_s1 }
0x147a   :  { %1217 = vrot.lane.b32.xlu0 %v1128_v40, %s1518_s0 }
0x148f   :  { %v1192_v42 = vpop.f32.mrf.mxu3 }
0x1490   :  { %v1193_v43 = vadd.f32 %v1314_v41, %v1192_v42 }
0x1492   :  { %1198 = vst [vmem:[%s2008_s10] sm:$0xff] %v1193_v43 }
0x14dc   :  { %v1132_v5 = vpop.permute.xlu0 %1131 }
0x14dd   :  { %v1134_v6 = vmul.f32 %v1132_v5, %v1117_v16 }
0x14df   :  { %v1146_v44 = vrot.slane %v1134_v6, 2  ;;  %1205 = vrot.lane.b32.xlu1 %v1134_v6, %s1517_s1 }
0x14e1   :  { %v1156_v12 = vsel %vm1152_vm7, %v1155_v33, %v1146_v44 }
0x14e2   :  { %1169 = vrot.lane.b32.xlu2 %v1156_v12, %s1517_s1 }
0x14e4   :  { %v1201_v13 = vpop.permute.xlu0 %1200 }
0x14e5   :  { %1204 = vst.msk [vmem:[#allocation8 - $0x6] sm:$0xc0] %vm1203_vm8, %v1201_v13 }
0x14ea   :  { %1212 = vrot.lane.b32.xlu2 %v1950_v15, %s1518_s0 }
0x14ec   :  { %v1218_v56 = vpop.permute.xlu0 %1217 }
0x14ed   :  { %1221 = vst.msk [vmem:[#allocation9 + $0x2] sm:$0x3] %vm1209_vm9, %v1218_v56 }
0x153c   :  { %v1170_v57 = vpop.permute.xlu2 %1169 }
0x153d   :  { %1295 = vmatmul.msk.f32.gmra.mxu3 %vm165_vm0, %v1170_v57 }
0x1544   :  { %v1213_v58 = vpop.permute.xlu2 %1212 }
0x1545   :  { %1215 = vst.msk [vmem:[#allocation9 - $0x6] sm:$0xc0] %vm1203_vm8, %v1213_v58 }
0x1546   :  { %1249 = dma.vmem_to_hbm [thread:$0]  %s1242_s23, 64, %s1244_s27, [#allocation10], %s1515_s25, %s1515_s25, %s1520_s4  }
0x1551   :  { %v1206_v59 = vpop.permute.xlu1 %1205 }
0x1552   :  { %1210 = vst.msk [vmem:[#allocation8 + $0x2] sm:$0x3] %vm1209_vm9, %v1206_v59 }
0x1553   :  { %1236 = dma.vmem_to_hbm [thread:$0]  %s1229_s29, 64, %s1231_s14, [#allocation4], %s1515_s25, %s1515_s25, %s1520_s4  }
0x15c0   :  { %v1195_v60 = vpop.f32.mrf.mxu3 }
0x15c1   :  { %v1196_v61 = vadd.f32 %v1314_v41, %v1195_v60 }
0x15c3   :  { %1199 = vst [vmem:[%s2008_s10 + $0x8] sm:$0xff] %v1196_v61 }
0x15c4   :  { %1503 = dma.done.wait [#allocation4], 64  }
0x15c5   :  { %1504 = vsyncadd [#allocation4], 4294967232 }
0x15c6   :  { %1505 = dma.done.wait [#allocation10], 64  }
0x15c7   :  { %1506 = vsyncadd [#allocation10], 4294967232 }
0x15c8   :  { %1260 = vsyncpa [#allocation3], 1 }
0x15c9   :  { %1261 = vsyncpa [#allocation6], 1 }
0x15ca   :  { %1262 = vsyncpa [#allocation4], 1 }
0x15cb   :  { %1263 = vsyncpa [#allocation10], 1 }

</bundles_post_ra>
